<compile_context>
chip_gen: v5e
topology: v5e:2x2
jax: 0.10.0
libtpu: 0.0.40
codegen_flags: <defaults>
</compile_context>

<pallas_src>
import functools
import math

import jax
import jax.numpy as jnp
from jax import lax
from jax.experimental import pallas as pl
from jax.experimental.pallas import tpu as pltpu

NEG_LARGE = -1.0e30  # finite "-inf" stand-in (avoids inf-inf NaN edge cases)


def _cdiv(a, b):
    return -(-a // b)


def _round_up(v, m):
    return ((v + m - 1) // m) * m


# --------------------------------------------------------------------------
# Kernel 1: stream the bag, per-partition online softmax + attention pooling.
# --------------------------------------------------------------------------
def stream_kernel(x_ref, w1_ref, b1_ref, wab_ref, wc_ref,
                  m_out_ref, l_out_ref, acc_out_ref,
                  m_sc, l_sc, acc_sc,
                  *, n_valid, n_pad, tile_n, tiles_per_part):
    p = pl.program_id(0)          # partition (parallel across cores on v7x)
    j = pl.program_id(1)          # tile within the partition (reduction)

    # ---- init running softmax / pooling state at the start of a partition ----
    @pl.when(j == 0)
    def _init():
        m_sc[...] = jnp.full_like(m_sc, NEG_LARGE)
        l_sc[...] = jnp.zeros_like(l_sc)
        acc_sc[...] = jnp.zeros_like(acc_sc)

    # ---- feature: Linear(1024 -> 512) + ReLU (Dropout == identity) ----
    x = x_ref[...]                                                    # (T,1024) bf16
    h = jnp.dot(x, w1_ref[...], preferred_element_type=jnp.float32)   # (T,512) f32
    h = jnp.maximum(h + b1_ref[...], 0.0)
    h_bf = h.astype(jnp.bfloat16)

    # ---- gated attention: one fused (512,256) matmul, split at lane 128 ----
    ab = jnp.dot(h_bf, wab_ref[...], preferred_element_type=jnp.float32)  # (T,256)
    a = jnp.maximum(ab[:, :128], 0.0)                                 # ReLU branch
    b = jax.nn.sigmoid(ab[:, 128:])                                   # sigmoid branch
    gated = a * b                                                     # (T,128) f32

    # ---- attention_c: Linear(128 -> 1, bias=False) as a lane reduction ----
    logits = jnp.sum(gated * wc_ref[...], axis=-1, keepdims=True)     # (T,1) f32

    # ---- mask rows beyond the true bag length (only emitted if padded) ----
    if n_pad != n_valid:
        base = (p * tiles_per_part + j) * tile_n
        row = lax.broadcasted_iota(jnp.int32, (tile_n, 1), 0)
        logits = jnp.where(row < (n_valid - base), logits, NEG_LARGE)

    # ---- online softmax + attention pooling (flash-style) ----
    m_prev = m_sc[...]                                                # (1,1)
    m_new = jnp.maximum(m_prev, jnp.max(logits, axis=0, keepdims=True))
    alpha = jnp.exp(m_prev - m_new)                                   # (1,1)
    pw = jnp.exp(logits - m_new)                                      # (T,1) f32; 0 on masked rows

    l_sc[...] = alpha * l_sc[...] + jnp.sum(pw, axis=0, keepdims=True)
    # (1,T) @ (T,512) on the MXU, in f32 (tiny matmul; keeps attn weights exact)
    partial = lax.dot_general(pw, h,
                              dimension_numbers=(((0,), (0,)), ((), ())),
                              preferred_element_type=jnp.float32)     # (1,512)
    acc_sc[...] = alpha * acc_sc[...] + partial
    m_sc[...] = m_new

    # ---- flush this partition's partial state on its last tile ----
    @pl.when(j == pl.num_programs(1) - 1)
    def _flush():
        m_out_ref[0] = m_sc[...]
        l_out_ref[0] = l_sc[...]
        acc_out_ref[0] = acc_sc[...]


# --------------------------------------------------------------------------
# Kernel 2: merge the per-partition partials + classifier Linear(512 -> C).
# --------------------------------------------------------------------------
def finalize_kernel(m_ref, l_ref, acc_ref, wcls_ref, bcls_ref, out_ref,
                    *, num_parts):
    m_glob = m_ref[0]                                   # (1,1)
    for k in range(1, num_parts):
        m_glob = jnp.maximum(m_glob, m_ref[k])

    l_glob = jnp.zeros((1, 1), jnp.float32)
    acc = jnp.zeros((1, 512), jnp.float32)
    for k in range(num_parts):
        s = jnp.exp(m_ref[k] - m_glob)                  # (1,1); 0 for empty part
        l_glob = l_glob + l_ref[k] * s
        acc = acc + acc_ref[k] * s

    pooled = acc / l_glob                               # (1,512) f32
    out_ref[...] = (jnp.dot(pooled, wcls_ref[...],
                            preferred_element_type=jnp.float32)
                    + bcls_ref[...])                    # (1,C) f32


# --------------------------------------------------------------------------
# Wrapper
# --------------------------------------------------------------------------
def attention_gated_forward(x, params, *, max_tile_n=1024, num_parts=2):
    """x: (1, N, 1024) bag of instances.  Returns (1, n_classes) float32."""
    x2d = jnp.squeeze(x, axis=0).astype(jnp.bfloat16)   # glue: x.squeeze(0)
    n = x2d.shape[0]
    n_classes = params["wcls"].shape[1]

    # Even tile split: cap padding waste at <16 rows per tile and keep the
    # sublane dim a multiple of 16 for bf16 packing.
    num_tiles = max(1, _cdiv(n, max_tile_n))
    parts = max(1, min(num_parts, num_tiles))           # no empty partitions
    tiles_per_part = _cdiv(num_tiles, parts)
    num_tiles = tiles_per_part * parts
    tile_n = _round_up(_cdiv(n, num_tiles), 16)
    n_pad = tile_n * num_tiles
    if n_pad != n:
        x2d = jnp.pad(x2d, ((0, n_pad - n), (0, 0)))

    kernel = functools.partial(stream_kernel, n_valid=n, n_pad=n_pad,
                               tile_n=tile_n, tiles_per_part=tiles_per_part)

    grid_spec = pltpu.PrefetchScalarGridSpec(
        num_scalar_prefetch=0,
        grid=(parts, tiles_per_part),
        in_specs=[
            # streamed x tile (double-buffered by the Pallas pipeline)
            pl.BlockSpec((tile_n, 1024), lambda p, j: (p * tiles_per_part + j, 0)),
            # resident weights (constant index map -> fetched once)
            pl.BlockSpec((1024, 512), lambda p, j: (0, 0)),   # w1
            pl.BlockSpec((1, 512), lambda p, j: (0, 0)),      # b1
            pl.BlockSpec((512, 256), lambda p, j: (0, 0)),    # w_ab = [wa | wb]
            pl.BlockSpec((1, 128), lambda p, j: (0, 0)),      # wc
        ],
        out_specs=(
            pl.BlockSpec((1, 1, 1), lambda p, j: (p, 0, 0)),      # m partial
            pl.BlockSpec((1, 1, 1), lambda p, j: (p, 0, 0)),      # l partial
            pl.BlockSpec((1, 1, 512), lambda p, j: (p, 0, 0)),    # acc partial
        ),
        scratch_shapes=[
            pltpu.VMEM((1, 1), jnp.float32),     # running max m
            pltpu.VMEM((1, 1), jnp.float32),     # running denom l
            pltpu.VMEM((1, 512), jnp.float32),   # running weighted sum
        ],
    )

    m_parts, l_parts, acc_parts = pl.pallas_call(
        kernel,
        out_shape=(
            jax.ShapeDtypeStruct((parts, 1, 1), jnp.float32),
            jax.ShapeDtypeStruct((parts, 1, 1), jnp.float32),
            jax.ShapeDtypeStruct((parts, 1, 512), jnp.float32),
        ),
        grid_spec=grid_spec,
        compiler_params=pltpu.CompilerParams(
            dimension_semantics=("parallel", "arbitrary"),
            vmem_limit_bytes=32 * 1024 * 1024,
        ),
    )(x2d, params["w1"], params["b1"], params["w_ab"], params["wc"])

    # Tiny finalize kernel: log-sum-exp merge of partials + classifier.
    fin = functools.partial(finalize_kernel, num_parts=parts)
    return pl.pallas_call(
        fin,
        out_shape=jax.ShapeDtypeStruct((1, n_classes), jnp.float32),
    )(m_parts, l_parts, acc_parts, params["wcls"], params["bcls"])


# --------------------------------------------------------------------------
# Params (xavier-normal, matches initialize_weights semantics) + f32 reference
# --------------------------------------------------------------------------
def init_params(key, n_classes):
    def xavier(key, fan_in, fan_out, dtype):
        std = math.sqrt(2.0 / (fan_in + fan_out))
        # stored as (in, out) == transpose of torch's (out, in) weight
        return (std * jax.random.normal(key, (fan_in, fan_out),
                                        dtype=jnp.float32)).astype(dtype)

    k1, ka, kb, kc, kcls = jax.random.split(key, 5)
    L, D = 512, 128
    wa = xavier(ka, L, D, jnp.bfloat16)                       # attention_a (no bias)
    wb = xavier(kb, L, D, jnp.bfloat16)                       # attention_b (no bias)
    return {
        "w1":   xavier(k1, 1024, L, jnp.bfloat16),            # feature Linear
        "b1":   jnp.zeros((1, L), dtype=jnp.float32),
        "w_ab": jnp.concatenate([wa, wb], axis=1),            # fused (512, 256)
        "wc":   xavier(kc, D, 1, jnp.float32).reshape(1, D),  # attention_c (no bias)
        "wcls": xavier(kcls, L, n_classes, jnp.float32),      # classifier (f32)
        "bcls": jnp.zeros((1, n_classes), dtype=jnp.float32),
    }


def reference_forward(x, params):
    """Pure-JAX f32 reference (dropout = identity); bf16 weights cast to f32."""
    x2d = jnp.squeeze(x, axis=0).astype(jnp.bfloat16).astype(jnp.float32)
    w1 = params["w1"].astype(jnp.float32)
    w_ab = params["w_ab"].astype(jnp.float32)
    h = jnp.maximum(x2d @ w1 + params["b1"], 0.0)             # (N,512)
    a = jnp.maximum(h @ w_ab[:, :128], 0.0)
    b = jax.nn.sigmoid(h @ w_ab[:, 128:])
    logits = jnp.sum((a * b) * params["wc"], axis=-1)         # (N,)
    att = jax.nn.softmax(logits)
    pooled = att @ h                                          # (512,)
    return pooled @ params["wcls"] + params["bcls"][0]        # (C,)


if __name__ == "__main__":
    key = jax.random.PRNGKey(0)
    kx, kp, kx2 = jax.random.split(key, 3)

    n_classes = 4
    params = init_params(kp, n_classes)

    # Small bag: single tile, single partition.
    x_small = jax.random.normal(kx, (1, 16, 1024), dtype=jnp.float32)
    y_small = attention_gated_forward(x_small, params)
    jax.block_until_ready(y_small)
    assert y_small.shape == (1, n_classes)

    # Bigger bag: exercises multi-tile streaming, 2 partitions and row masking.
    x_big = jax.random.normal(kx2, (1, 250, 1024), dtype=jnp.float32)
    y_big = attention_gated_forward(x_big, params, max_tile_n=64, num_parts=2)
    jax.block_until_ready(y_big)
    assert y_big.shape == (1, n_classes)

    # Validate against the pure-f32 JAX reference (bf16 matmuls => loose tol).
    for x_in, y_out in ((x_small, y_small), (x_big, y_big)):
        y_ref = reference_forward(x_in, params)
        err = float(jnp.max(jnp.abs(y_out[0] - y_ref)))
        assert err < 0.1, f"max |diff| vs f32 reference = {err}"

    # TODO(synk): nn.Dropout(0.25) layers are treated as identity (eval mode).
    print("KERNEL_OK")
</pallas_src>

<mosaic_0001>
module attributes {stable_mosaic.version = 11 : i64} {
  func.func @stream_kernel(%arg0: i32, %arg1: i32, %arg2: memref<16x1024xbf16, #tpu.memory_space<vmem>>, %arg3: memref<1024x512xbf16, #tpu.memory_space<vmem>>, %arg4: memref<1x512xf32, #tpu.memory_space<vmem>>, %arg5: memref<512x256xbf16, #tpu.memory_space<vmem>>, %arg6: memref<1x128xf32, #tpu.memory_space<vmem>>, %arg7: memref<1x1x1xf32, #tpu.memory_space<vmem>>, %arg8: memref<1x1x1xf32, #tpu.memory_space<vmem>>, %arg9: memref<1x1x512xf32, #tpu.memory_space<vmem>>, %arg10: memref<1x1xf32, #tpu.memory_space<vmem>>, %arg11: memref<1x1xf32, #tpu.memory_space<vmem>>, %arg12: memref<1x512xf32, #tpu.memory_space<vmem>>) attributes {dimension_semantics = [#tpu.dimension_semantics<parallel>, #tpu.dimension_semantics<arbitrary>], iteration_bounds = array<i64: 1, 1>, scalar_prefetch = 0 : i64, scratch_operands = 3 : i64, tpu.core_type = #tpu.core_type<tc>, window_params = [{transform_indices = @transform_0, window_bounds = array<i64: 16, 1024>}, {pipeline_mode = #tpu.pipeline_mode<synchronous>, transform_indices = @transform_1, window_bounds = array<i64: 1024, 512>}, {pipeline_mode = #tpu.pipeline_mode<synchronous>, transform_indices = @transform_2, window_bounds = array<i64: 1, 512>}, {pipeline_mode = #tpu.pipeline_mode<synchronous>, transform_indices = @transform_3, window_bounds = array<i64: 512, 256>}, {pipeline_mode = #tpu.pipeline_mode<synchronous>, transform_indices = @transform_4, window_bounds = array<i64: 1, 128>}, {transform_indices = @transform_5, window_bounds = array<i64: 1, 1, 1>}, {transform_indices = @transform_6, window_bounds = array<i64: 1, 1, 1>}, {transform_indices = @transform_7, window_bounds = array<i64: 1, 1, 512>}]} {
    %c0_i32 = arith.constant 0 : i32
    %0 = arith.cmpi eq, %arg1, %c0_i32 : i32
    %1 = arith.extui %0 : i1 to i32
    %c0_i32_0 = arith.constant 0 : i32
    %2 = arith.cmpi ne, %1, %c0_i32_0 : i32
    scf.if %2 {
      %cst_32 = arith.constant -1.000000e+30 : f32
      %54 = vector.broadcast %cst_32 : f32 to vector<1x1xf32>
      %c0_33 = arith.constant 0 : index
      %c0_34 = arith.constant 0 : index
      %55 = vector.load %arg10[%c0_33, %c0_34] : memref<1x1xf32, #tpu.memory_space<vmem>>, vector<1x1xf32>
      tpu.vector_store %arg10[%c0_33, %c0_34], %54 {strides = array<i32>} : memref<1x1xf32, #tpu.memory_space<vmem>>, vector<1x1xf32>,
      %cst_35 = arith.constant 0.000000e+00 : f32
      %56 = vector.broadcast %cst_35 : f32 to vector<1x1xf32>
      %c0_36 = arith.constant 0 : index
      %c0_37 = arith.constant 0 : index
      %57 = vector.load %arg11[%c0_36, %c0_37] : memref<1x1xf32, #tpu.memory_space<vmem>>, vector<1x1xf32>
      tpu.vector_store %arg11[%c0_36, %c0_37], %56 {strides = array<i32>} : memref<1x1xf32, #tpu.memory_space<vmem>>, vector<1x1xf32>,
      %cst_38 = arith.constant 0.000000e+00 : f32
      %58 = vector.broadcast %cst_38 : f32 to vector<1x512xf32>
      %c0_39 = arith.constant 0 : index
      %c0_40 = arith.constant 0 : index
      %59 = vector.load %arg12[%c0_39, %c0_40] : memref<1x512xf32, #tpu.memory_space<vmem>>, vector<1x512xf32>
      tpu.vector_store %arg12[%c0_39, %c0_40], %58 {strides = array<i32>} : memref<1x512xf32, #tpu.memory_space<vmem>>, vector<1x512xf32>,
    } else {
    }
    %c0 = arith.constant 0 : index
    %c0_1 = arith.constant 0 : index
    %3 = vector.load %arg2[%c0, %c0_1] : memref<16x1024xbf16, #tpu.memory_space<vmem>>, vector<16x1024xbf16>
    %c0_2 = arith.constant 0 : index
    %c0_3 = arith.constant 0 : index
    %4 = vector.load %arg3[%c0_2, %c0_3] : memref<1024x512xbf16, #tpu.memory_space<vmem>>, vector<1024x512xbf16>
    %cst = arith.constant dense<0.000000e+00> : vector<16x512xf32>
    %5 = tpu.matmul %3, %4, %cst {dimension_numbers = #tpu.dot_dimension_numbers<[1], [0], [0], [1], [0, 0, 1, 1], [], []>} : vector<16x1024xbf16>, vector<1024x512xbf16>, vector<16x512xf32> -> vector<16x512xf32>
    %c0_4 = arith.constant 0 : index
    %c0_5 = arith.constant 0 : index
    %6 = vector.load %arg4[%c0_4, %c0_5] : memref<1x512xf32, #tpu.memory_space<vmem>>, vector<1x512xf32>
    %7 = vector.broadcast %6 : vector<1x512xf32> to vector<16x512xf32>
    %8 = arith.addf %5, %7 : vector<16x512xf32>
    %cst_6 = arith.constant 0.000000e+00 : f32
    %9 = vector.broadcast %cst_6 : f32 to vector<16x512xf32>
    %10 = arith.maximumf %8, %9 : vector<16x512xf32>
    %11 = arith.truncf %10 : vector<16x512xf32> to vector<16x512xbf16>
    %c0_7 = arith.constant 0 : index
    %c0_8 = arith.constant 0 : index
    %12 = vector.load %arg5[%c0_7, %c0_8] : memref<512x256xbf16, #tpu.memory_space<vmem>>, vector<512x256xbf16>
    %cst_9 = arith.constant dense<0.000000e+00> : vector<16x256xf32>
    %13 = tpu.matmul %11, %12, %cst_9 {dimension_numbers = #tpu.dot_dimension_numbers<[1], [0], [0], [1], [0, 0, 1, 1], [], []>} : vector<16x512xbf16>, vector<512x256xbf16>, vector<16x256xf32> -> vector<16x256xf32>
    %14 = vector.extract_strided_slice %13 {offsets = [0, 0], sizes = [16, 128], strides = [1, 1]} : vector<16x256xf32> to vector<16x128xf32>
    %cst_10 = arith.constant 0.000000e+00 : f32
    %15 = vector.broadcast %cst_10 : f32 to vector<16x128xf32>
    %16 = arith.maximumf %14, %15 : vector<16x128xf32>
    %17 = vector.extract_strided_slice %13 {offsets = [0, 128], sizes = [16, 128], strides = [1, 1]} : vector<16x256xf32> to vector<16x128xf32>
    %18 = arith.negf %17 : vector<16x128xf32>
    %19 = math.exp %18 : vector<16x128xf32>
    %cst_11 = arith.constant 1.000000e+00 : f32
    %20 = vector.broadcast %cst_11 : f32 to vector<16x128xf32>
    %21 = arith.addf %20, %19 : vector<16x128xf32>
    %22 = arith.divf %20, %21 : vector<16x128xf32>
    %23 = arith.mulf %16, %22 : vector<16x128xf32>
    %c0_12 = arith.constant 0 : index
    %c0_13 = arith.constant 0 : index
    %24 = vector.load %arg6[%c0_12, %c0_13] : memref<1x128xf32, #tpu.memory_space<vmem>>, vector<1x128xf32>
    %25 = vector.broadcast %24 : vector<1x128xf32> to vector<16x128xf32>
    %26 = arith.mulf %23, %25 : vector<16x128xf32>
    %cst_14 = arith.constant dense<0.000000e+00> : vector<16xf32>
    %27 = vector.multi_reduction <add>, %26, %cst_14 [1] : vector<16x128xf32> to vector<16xf32>
    %28 = vector.shape_cast %27 : vector<16xf32> to vector<16x1xf32>
    %c0_15 = arith.constant 0 : index
    %c0_16 = arith.constant 0 : index
    %29 = vector.load %arg10[%c0_15, %c0_16] : memref<1x1xf32, #tpu.memory_space<vmem>>, vector<1x1xf32>
    %cst_17 = arith.constant dense<0xFF800000> : vector<1xf32>
    %30 = vector.multi_reduction <maximumf>, %28, %cst_17 [0] : vector<16x1xf32> to vector<1xf32>
    %31 = vector.shape_cast %30 : vector<1xf32> to vector<1x1xf32>
    %32 = arith.maximumf %29, %31 : vector<1x1xf32>
    %33 = arith.subf %29, %32 : vector<1x1xf32>
    %34 = math.exp %33 : vector<1x1xf32>
    %35 = vector.broadcast %32 : vector<1x1xf32> to vector<16x1xf32>
    %36 = arith.subf %28, %35 : vector<16x1xf32>
    %37 = math.exp %36 : vector<16x1xf32>
    %c0_18 = arith.constant 0 : index
    %c0_19 = arith.constant 0 : index
    %38 = vector.load %arg11[%c0_18, %c0_19] : memref<1x1xf32, #tpu.memory_space<vmem>>, vector<1x1xf32>
    %39 = arith.mulf %34, %38 : vector<1x1xf32>
    %cst_20 = arith.constant dense<0.000000e+00> : vector<1xf32>
    %40 = vector.multi_reduction <add>, %37, %cst_20 [0] : vector<16x1xf32> to vector<1xf32>
    %41 = vector.shape_cast %40 : vector<1xf32> to vector<1x1xf32>
    %42 = arith.addf %39, %41 : vector<1x1xf32>
    %c0_21 = arith.constant 0 : index
    %c0_22 = arith.constant 0 : index
    %43 = vector.load %arg11[%c0_21, %c0_22] : memref<1x1xf32, #tpu.memory_space<vmem>>, vector<1x1xf32>
    tpu.vector_store %arg11[%c0_21, %c0_22], %42 {strides = array<i32>} : memref<1x1xf32, #tpu.memory_space<vmem>>, vector<1x1xf32>,
    %cst_23 = arith.constant dense<0.000000e+00> : vector<1x512xf32>
    %44 = tpu.matmul %37, %10, %cst_23 {dimension_numbers = #tpu.dot_dimension_numbers<[0], [0], [1], [1], [0, 1, 1, 1], [], []>} : vector<16x1xf32>, vector<16x512xf32>, vector<1x512xf32> -> vector<1x512xf32>
    %c0_24 = arith.constant 0 : index
    %c0_25 = arith.constant 0 : index
    %45 = vector.load %arg12[%c0_24, %c0_25] : memref<1x512xf32, #tpu.memory_space<vmem>>, vector<1x512xf32>
    %46 = vector.broadcast %34 : vector<1x1xf32> to vector<1x512xf32>
    %47 = arith.mulf %46, %45 : vector<1x512xf32>
    %48 = arith.addf %47, %44 : vector<1x512xf32>
    %c0_26 = arith.constant 0 : index
    %c0_27 = arith.constant 0 : index
    %49 = vector.load %arg12[%c0_26, %c0_27] : memref<1x512xf32, #tpu.memory_space<vmem>>, vector<1x512xf32>
    tpu.vector_store %arg12[%c0_26, %c0_27], %48 {strides = array<i32>} : memref<1x512xf32, #tpu.memory_space<vmem>>, vector<1x512xf32>,
    %c0_28 = arith.constant 0 : index
    %c0_29 = arith.constant 0 : index
    %50 = vector.load %arg10[%c0_28, %c0_29] : memref<1x1xf32, #tpu.memory_space<vmem>>, vector<1x1xf32>
    tpu.vector_store %arg10[%c0_28, %c0_29], %32 {strides = array<i32>} : memref<1x1xf32, #tpu.memory_space<vmem>>, vector<1x1xf32>,
    %c0_i32_30 = arith.constant 0 : i32
    %51 = arith.cmpi eq, %arg1, %c0_i32_30 : i32
    %52 = arith.extui %51 : i1 to i32
    %c0_i32_31 = arith.constant 0 : i32
    %53 = arith.cmpi ne, %52, %c0_i32_31 : i32
    scf.if %53 {
      %c0_32 = arith.constant 0 : index
      %c0_33 = arith.constant 0 : index
      %54 = vector.load %arg10[%c0_32, %c0_33] : memref<1x1xf32, #tpu.memory_space<vmem>>, vector<1x1xf32>
      %c0_34 = arith.constant 0 : index
      %c0_35 = arith.constant 0 : index
      %c0_36 = arith.constant 0 : index
      %55 = vector.load %arg7[%c0_34, %c0_35, %c0_36] : memref<1x1x1xf32, #tpu.memory_space<vmem>>, vector<1x1x1xf32>
      %56 = vector.shape_cast %55 : vector<1x1x1xf32> to vector<1x1xf32>
      %57 = vector.shape_cast %54 : vector<1x1xf32> to vector<1x1x1xf32>
      tpu.vector_store %arg7[%c0_34, %c0_35, %c0_36], %57 {strides = array<i32>} : memref<1x1x1xf32, #tpu.memory_space<vmem>>, vector<1x1x1xf32>,
      %c0_37 = arith.constant 0 : index
      %c0_38 = arith.constant 0 : index
      %58 = vector.load %arg11[%c0_37, %c0_38] : memref<1x1xf32, #tpu.memory_space<vmem>>, vector<1x1xf32>
      %c0_39 = arith.constant 0 : index
      %c0_40 = arith.constant 0 : index
      %c0_41 = arith.constant 0 : index
      %59 = vector.load %arg8[%c0_39, %c0_40, %c0_41] : memref<1x1x1xf32, #tpu.memory_space<vmem>>, vector<1x1x1xf32>
      %60 = vector.shape_cast %59 : vector<1x1x1xf32> to vector<1x1xf32>
      %61 = vector.shape_cast %58 : vector<1x1xf32> to vector<1x1x1xf32>
      tpu.vector_store %arg8[%c0_39, %c0_40, %c0_41], %61 {strides = array<i32>} : memref<1x1x1xf32, #tpu.memory_space<vmem>>, vector<1x1x1xf32>,
      %c0_42 = arith.constant 0 : index
      %c0_43 = arith.constant 0 : index
      %62 = vector.load %arg12[%c0_42, %c0_43] : memref<1x512xf32, #tpu.memory_space<vmem>>, vector<1x512xf32>
      %c0_44 = arith.constant 0 : index
      %c0_45 = arith.constant 0 : index
      %c0_46 = arith.constant 0 : index
      %63 = vector.load %arg9[%c0_44, %c0_45, %c0_46] : memref<1x1x512xf32, #tpu.memory_space<vmem>>, vector<1x1x512xf32>
      %64 = vector.shape_cast %63 : vector<1x1x512xf32> to vector<1x512xf32>
      %65 = vector.shape_cast %62 : vector<1x512xf32> to vector<1x1x512xf32>
      tpu.vector_store %arg9[%c0_44, %c0_45, %c0_46], %65 {strides = array<i32>} : memref<1x1x512xf32, #tpu.memory_space<vmem>>, vector<1x1x512xf32>,
    } else {
    }
    return
  }
  func.func @transform_0(%arg0: i32, %arg1: i32) -> (i32, i32) {
    %c1_i32 = arith.constant 1 : i32
    %0 = arith.muli %arg0, %c1_i32 : i32
    %1 = arith.addi %0, %arg1 : i32
    %c0_i32 = arith.constant 0 : i32
    %c0_i32_0 = arith.constant 0 : i32
    return %1, %c0_i32 : i32, i32
  }
  func.func @transform_1(%arg0: i32, %arg1: i32) -> (i32, i32) {
    %c0_i32 = arith.constant 0 : i32
    %c0_i32_0 = arith.constant 0 : i32
    %c0_i32_1 = arith.constant 0 : i32
    return %c0_i32, %c0_i32_0 : i32, i32
  }
  func.func @transform_2(%arg0: i32, %arg1: i32) -> (i32, i32) {
    %c0_i32 = arith.constant 0 : i32
    %c0_i32_0 = arith.constant 0 : i32
    %c0_i32_1 = arith.constant 0 : i32
    return %c0_i32, %c0_i32_0 : i32, i32
  }
  func.func @transform_3(%arg0: i32, %arg1: i32) -> (i32, i32) {
    %c0_i32 = arith.constant 0 : i32
    %c0_i32_0 = arith.constant 0 : i32
    %c0_i32_1 = arith.constant 0 : i32
    return %c0_i32, %c0_i32_0 : i32, i32
  }
  func.func @transform_4(%arg0: i32, %arg1: i32) -> (i32, i32) {
    %c0_i32 = arith.constant 0 : i32
    %c0_i32_0 = arith.constant 0 : i32
    %c0_i32_1 = arith.constant 0 : i32
    return %c0_i32, %c0_i32_0 : i32, i32
  }
  func.func @transform_5(%arg0: i32, %arg1: i32) -> (i32, i32, i32) {
    %c0_i32 = arith.constant 0 : i32
    %c0_i32_0 = arith.constant 0 : i32
    %c0_i32_1 = arith.constant 0 : i32
    return %arg0, %c0_i32, %c0_i32_0 : i32, i32, i32
  }
  func.func @transform_6(%arg0: i32, %arg1: i32) -> (i32, i32, i32) {
    %c0_i32 = arith.constant 0 : i32
    %c0_i32_0 = arith.constant 0 : i32
    %c0_i32_1 = arith.constant 0 : i32
    return %arg0, %c0_i32, %c0_i32_0 : i32, i32, i32
  }
  func.func @transform_7(%arg0: i32, %arg1: i32) -> (i32, i32, i32) {
    %c0_i32 = arith.constant 0 : i32
    %c0_i32_0 = arith.constant 0 : i32
    %c0_i32_1 = arith.constant 0 : i32
    return %arg0, %c0_i32, %c0_i32_0 : i32, i32, i32
  }
}

</mosaic_0001>

<bundles_post_ra>
// kernel: tpu_custom_call.1
= control target key start
LH: loop header
LB: loop body
LE: loop exit
PB: predicated region body
PF: predicated region fallthrough
CT: control target
= control target key end

     0   :  { %13 = vsyncpa [#allocation6], 0  ;;  %s5038_s0 = inlined_call_operand.hbm [shape: bf16[16,1024], index: 0, kind: input, shape index: {}]   ;;  %s5039_s1 = inlined_call_operand.hbm [shape: bf16[1024,512], index: 1, kind: input, shape index: {}]   ;;  %s5040_s2 = inlined_call_operand.hbm [shape: f32[1,512], index: 2, kind: input, shape index: {}]   ;;  %s5041_s3 = inlined_call_operand.hbm [shape: bf16[512,256], index: 3, kind: input, shape index: {}]   ;;  %s5042_s4 = inlined_call_operand.vmem [shape: f32[1,128], index: 4, kind: input, shape index: {}]   ;;  %s5043_s5 = inlined_call_operand.hbm [shape: f32[1,1,1], index: 5, kind: output, shape index: {0}]   ;;  %s5044_s6 = inlined_call_operand.hbm [shape: f32[1,1,1], index: 6, kind: output, shape index: {1}]   ;;  %s5045_s7 = inlined_call_operand.hbm [shape: f32[1,1,512], index: 7, kind: output, shape index: {2}]  }
   0x1   :  { %14 = vsyncpa [#allocation9], 0 }
   0x2   :  { %15 = vsyncpa [#allocation12], 0 }
   0x3   :  { %16 = vsyncpa [#allocation7], 0  ;;  %s40_s26 = sshll.u32 %s5039_s1, 4  ;;  %s41_s26 = int_to_ptr.hbm [resolvable:$true] %s40_s26 }
   0x4   :  { %17 = vsyncpa [#allocation15], 0  ;;  %s4804_s27 = smov [#allocation8]   ;;  %s27_s8 = sshll.u32 %s5038_s0, 4  ;;  %s28_s8 = int_to_ptr.hbm [resolvable:$true] %s27_s8 }
   0x5   :  { %s42_s28 = sshll.u32 %s4804_s27, 4  ;;  %s4805_s9 = smov 256   ;;  %s43_s28 = int_to_ptr.vmem [resolvable:$true] %s42_s28 }
   0x6   :  { %s4806_s10 = smov 16   ;;  %s4807_s11 = smov [#allocation5]  }
   0x7   :  { %48 = dma.hbm_to_vmem [thread:$0]  %s41_s26, 32768, %s43_s28, [#allocation9], %s4805_s9, %s4805_s9, %s4806_s10  }
   0x8   :  { %s29_s12 = sshll.u32 %s4807_s11, 4  ;;  %s4808_s13 = smov 512   ;;  %s30_s12 = int_to_ptr.vmem [resolvable:$true] %s29_s12 }
   0x9   :  { %s4809_s14 = smov 32   ;;  %s54_s16 = sshll.u32 %s5040_s2, 4  ;;  %s55_s16 = int_to_ptr.hbm [resolvable:$true] %s54_s16 }
   0xa   :  { %35 = dma.hbm_to_vmem [thread:$0]  %s28_s8, 1024, %s30_s12, [#allocation6], %s4808_s13, %s4808_s13, %s4809_s14  }
   0xb   :  { %s4810_s17 = smov [#allocation10]   ;;  %s64_s20 = sshll.u32 %s5041_s3, 4  ;;  %s65_s20 = int_to_ptr.hbm [resolvable:$true] %s64_s20 }
   0xc   :  { %s56_s18 = sshll.u32 %s4810_s17, 4  ;;  %s4811_s21 = smov [#allocation11]   ;;  %s57_s18 = int_to_ptr.vmem [resolvable:$true] %s56_s18 }
   0xd   :  { %59 = dma.hbm_to_vmem [thread:$0]  %s55_s16, 64, %s57_s18, [#allocation9]  }
   0xe   :  { %s66_s22 = sshll.u32 %s4811_s21, 4  ;;  %s4812_s23 = smov 128   ;;  %s67_s22 = int_to_ptr.vmem [resolvable:$true] %s66_s22 }
   0xf   :  { %s4813_s24 = smov 8  }
  0x10   :  { %72 = dma.hbm_to_vmem [thread:$0]  %s65_s20, 8192, %s67_s22, [#allocation12], %s4812_s23, %s4812_s23, %s4813_s24  }
  0x11   :  { %4794 = dma.done.wait [#allocation6], 1024  }
  0x12   :  { %4795 = vsyncadd [#allocation6], 4294966272 }
  0x13   :  { %4796 = dma.done.wait [#allocation9], 32832  }
  0x14   :  { %4797 = vsyncadd [#allocation9], 4294934464 }
  0x15   :  { %4798 = dma.done.wait [#allocation12], 8192  }
  0x16   :  { %4799 = vsyncadd [#allocation12], 4294959104  ;;  %v3093_v0 = vld [vmem:[#allocation8 + $0xe0] sm:$0xf]  ;;  %v4303_v1 = vld [vmem:[#allocation8 + $0xec] sm:$0xf0] }
  0x17   :  { %v3221_v2 = vld [vmem:[#allocation8 + $0x1e0] sm:$0xf]  ;;  %v3094_v3 = vor.u32 %v4303_v1, %v3093_v0  ;;  %v4335_v4 = vld [vmem:[#allocation8 + $0x1ec] sm:$0xf0]  ;;  %vm97_vm8 = vcmask 0   ;;  %vm2730_vm10 = vcmask 7168  }
  0x18   :  { %v3349_v5 = vld [vmem:[#allocation8 + $0x2e0] sm:$0xf]  ;;  %v4367_v6 = vld [vmem:[#allocation8 + $0x2ec] sm:$0xf0]  ;;  %v3222_v7 = vor.u32 %v4335_v4, %v3221_v2  ;;  %vm2775_vm11 = vcmask 130048   ;;  %s2915_s26 = sshll.u32 %s5044_s6, 4  ;;  %s2916_s26 = int_to_ptr.hbm [resolvable:$true] %s2915_s26 }
  0x19   :  { %v3350_v8 = vor.u32 %v4367_v6, %v3349_v5  ;;  %v3477_v9 = vld [vmem:[#allocation8 + $0x3e0] sm:$0xf]  ;;  %v4399_v10 = vld [vmem:[#allocation8 + $0x3ec] sm:$0xf0]  ;;  %1699 = vmatpush.bf16.msra.mxu0 %v3094_v3  ;;  %s4817_s27 = smov [#allocation14]   ;;  %s4818_s29 = smov [#allocation13]  }
  0x1a   :  { %v3077_v11 = vld [vmem:[#allocation8 + $0xc0] sm:$0xf]  ;;  %v3478_v12 = vor.u32 %v4399_v10, %v3477_v9  ;;  %v4299_v13 = vld [vmem:[#allocation8 + $0xcc] sm:$0xf0]  ;;  %1713 = vmatpush.bf16.msra.mxu1 %v3222_v7  ;;  %s2913_s28 = sshll.u32 %s4817_s27, 4  ;;  %s2902_s30 = sshll.u32 %s4818_s29, 4  ;;  %s2914_s28 = int_to_ptr.vmem [resolvable:$true] %s2913_s28  ;;  %s2903_s30 = int_to_ptr.vmem [resolvable:$true] %s2902_s30 }
  0x1b   :  { %v3205_v14 = vld [vmem:[#allocation8 + $0x1c0] sm:$0xf]  ;;  %v4331_v15 = vld [vmem:[#allocation8 + $0x1cc] sm:$0xf0]  ;;  %1727 = vmatpush.bf16.msra.mxu2 %v3350_v8  ;;  %v3078_v16 = vor.u32 %v4299_v13, %v3077_v11  ;;  %s2904_s10 = sshll.u32 %s5043_s5, 4  ;;  %vm2874_vm12 = vcmask 1040384   ;;  %s2905_s10 = int_to_ptr.hbm [resolvable:$true] %s2904_s10 }
  0x1c   :  { %v3206_v17 = vor.u32 %v4331_v15, %v3205_v14  ;;  %v3333_v18 = vld [vmem:[#allocation8 + $0x2c0] sm:$0xf]  ;;  %v4363_v19 = vld [vmem:[#allocation8 + $0x2cc] sm:$0xf0]  ;;  %1741 = vmatpush.bf16.msra.mxu3 %v3478_v12  ;;  %vm2876_vm13 = vcmask 1042434   ;;  %vm2878_vm14 = vcmask 1041408  }
  0x1d   :  { %v3461_v20 = vld [vmem:[#allocation8 + $0x3c0] sm:$0xf]  ;;  %v3334_v21 = vor.u32 %v4363_v19, %v3333_v18  ;;  %v4395_v22 = vld [vmem:[#allocation8 + $0x3cc] sm:$0xf0]  ;;  %1700 = vmatpush.bf16.msra.mxu0 %v3078_v16  ;;  %s4819_s5 = smov [#allocation16]   ;;  %s2926_s13 = sshll.u32 %s5045_s7, 4  ;;  %s2927_s13 = int_to_ptr.hbm [resolvable:$true] %s2926_s13 }
  0x1e   :  { %v3061_v23 = vld [vmem:[#allocation8 + $0xa0] sm:$0xf]  ;;  %v4295_v24 = vld [vmem:[#allocation8 + $0xac] sm:$0xf0]  ;;  %v3462_v25 = vor.u32 %v4395_v22, %v3461_v20  ;;  %1714 = vmatpush.bf16.msra.mxu1 %v3206_v17  ;;  %s2924_s6 = sshll.u32 %s4819_s5, 4  ;;  %s2925_s6 = int_to_ptr.vmem [resolvable:$true] %s2924_s6 }
  0x1f   :  { %v3189_v26 = vld [vmem:[#allocation8 + $0x1a0] sm:$0xf]  ;;  %v4327_v27 = vld [vmem:[#allocation8 + $0x1ac] sm:$0xf0]  ;;  %v3062_v29 = vor.u32 %v4295_v24, %v3061_v23  ;;  %1728 = vmatpush.bf16.msra.mxu2 %v3334_v21 }
  0x20   :  { %v3317_v28 = vld [vmem:[#allocation8 + $0x2a0] sm:$0xf]  ;;  %v4359_v30 = vld [vmem:[#allocation8 + $0x2ac] sm:$0xf0]  ;;  %v3190_v33 = vor.u32 %v4327_v27, %v3189_v26  ;;  %1742 = vmatpush.bf16.msra.mxu3 %v3462_v25 }
  0x21   :  { %v3445_v31 = vld [vmem:[#allocation8 + $0x3a0] sm:$0xf]  ;;  %v4391_v32 = vld [vmem:[#allocation8 + $0x3ac] sm:$0xf0]  ;;  %v3318_v34 = vor.u32 %v4359_v30, %v3317_v28  ;;  %1701 = vmatpush.bf16.msra.mxu0 %v3062_v29 }
  0x22   :  { %v3045_v35 = vld [vmem:[#allocation8 + $0x80] sm:$0xf]  ;;  %v4291_v36 = vld [vmem:[#allocation8 + $0x8c] sm:$0xf0]  ;;  %v3446_v38 = vor.u32 %v4391_v32, %v3445_v31  ;;  %1715 = vmatpush.bf16.msra.mxu1 %v3190_v33 }
  0x23   :  { %v3173_v37 = vld [vmem:[#allocation8 + $0x180] sm:$0xf]  ;;  %v4323_v39 = vld [vmem:[#allocation8 + $0x18c] sm:$0xf0]  ;;  %v3046_v44 = vor.u32 %v4291_v36, %v3045_v35  ;;  %1729 = vmatpush.bf16.msra.mxu2 %v3318_v34 }
  0x24   :  { %v3301_v40 = vld [vmem:[#allocation8 + $0x280] sm:$0xf]  ;;  %v4355_v41 = vld [vmem:[#allocation8 + $0x28c] sm:$0xf0]  ;;  %v3174_v45 = vor.u32 %v4323_v39, %v3173_v37  ;;  %1743 = vmatpush.bf16.msra.mxu3 %v3446_v38 }
  0x25   :  { %v3429_v42 = vld [vmem:[#allocation8 + $0x380] sm:$0xf]  ;;  %v4387_v43 = vld [vmem:[#allocation8 + $0x38c] sm:$0xf0]  ;;  %v3302_v46 = vor.u32 %v4355_v41, %v3301_v40  ;;  %1702 = vmatpush.bf16.msra.mxu0 %v3046_v44 }
  0x26   :  { %v3029_v47 = vld [vmem:[#allocation8 + $0x60] sm:$0xf]  ;;  %v4287_v48 = vld [vmem:[#allocation8 + $0x6c] sm:$0xf0]  ;;  %v3430_v50 = vor.u32 %v4387_v43, %v3429_v42  ;;  %1716 = vmatpush.bf16.msra.mxu1 %v3174_v45 }
  0x27   :  { %v3157_v49 = vld [vmem:[#allocation8 + $0x160] sm:$0xf]  ;;  %v4319_v51 = vld [vmem:[#allocation8 + $0x16c] sm:$0xf0]  ;;  %v3030_v56 = vor.u32 %v4287_v48, %v3029_v47  ;;  %1730 = vmatpush.bf16.msra.mxu2 %v3302_v46 }
  0x28   :  { %v3285_v52 = vld [vmem:[#allocation8 + $0x260] sm:$0xf]  ;;  %v4351_v53 = vld [vmem:[#allocation8 + $0x26c] sm:$0xf0]  ;;  %v3158_v57 = vor.u32 %v4319_v51, %v3157_v49  ;;  %1744 = vmatpush.bf16.msra.mxu3 %v3430_v50 }
  0x29   :  { %v3413_v54 = vld [vmem:[#allocation8 + $0x360] sm:$0xf]  ;;  %v4383_v55 = vld [vmem:[#allocation8 + $0x36c] sm:$0xf0]  ;;  %v3286_v58 = vor.u32 %v4351_v53, %v3285_v52  ;;  %1703 = vmatpush.bf16.msra.mxu0 %v3030_v56 }
  0x2a   :  { %v3013_v59 = vld [vmem:[#allocation8 + $0x40] sm:$0xf]  ;;  %v4283_v60 = vld [vmem:[#allocation8 + $0x4c] sm:$0xf0]  ;;  %v3414_v62 = vor.u32 %v4383_v55, %v3413_v54  ;;  %1717 = vmatpush.bf16.msra.mxu1 %v3158_v57  ;;  %v2957_v54 = vld [vmem:[#allocation5 + $0x8] sm:$0xf] }
  0x2b   :  { %v3141_v61 = vld [vmem:[#allocation8 + $0x140] sm:$0xf]  ;;  %v4315_v63 = vld [vmem:[#allocation8 + $0x14c] sm:$0xf0]  ;;  %v3014_v4 = vor.u32 %v4283_v60, %v3013_v59  ;;  %1731 = vmatpush.bf16.msra.mxu2 %v3286_v58  ;;  %v4270_v59 = vld [vmem:[#allocation5 + $0x24] sm:$0xf0] }
  0x2c   :  { %v3269_v0 = vld [vmem:[#allocation8 + $0x240] sm:$0xf]  ;;  %v4347_v1 = vld [vmem:[#allocation8 + $0x24c] sm:$0xf0]  ;;  %v3142_v5 = vor.u32 %v4315_v63, %v3141_v61  ;;  %1745 = vmatpush.bf16.msra.mxu3 %v3414_v62 }
  0x2d   :  { %v3397_v2 = vld [vmem:[#allocation8 + $0x340] sm:$0xf]  ;;  %v4379_v3 = vld [vmem:[#allocation8 + $0x34c] sm:$0xf0]  ;;  %v3270_v6 = vor.u32 %v4347_v1, %v3269_v0  ;;  %1704 = vmatpush.bf16.msra.mxu0 %v3014_v4  ;;  %v4874_v1 = vor.u32 %v4270_v59, %v2957_v54 }
  0x2e   :  { %v2997_v7 = vld [vmem:[#allocation8 + $0x20] sm:$0xf]  ;;  %v4279_v8 = vld [vmem:[#allocation8 + $0x2c] sm:$0xf0]  ;;  %v3398_v10 = vor.u32 %v4379_v3, %v3397_v2  ;;  %1718 = vmatpush.bf16.msra.mxu1 %v3142_v5 }
  0x2f   :  { %v3125_v9 = vld [vmem:[#allocation8 + $0x120] sm:$0xf]  ;;  %v4311_v11 = vld [vmem:[#allocation8 + $0x12c] sm:$0xf0]  ;;  %v2998_v16 = vor.u32 %v4279_v8, %v2997_v7  ;;  %1732 = vmatpush.bf16.msra.mxu2 %v3270_v6  ;;  %v4265_v6 = vld [vmem:[#allocation5 + $0x4] sm:$0xf] }
  0x30   :  { %v3253_v12 = vld [vmem:[#allocation8 + $0x220] sm:$0xf]  ;;  %v4343_v13 = vld [vmem:[#allocation8 + $0x22c] sm:$0xf0]  ;;  %v3126_v19 = vor.u32 %v4311_v11, %v3125_v9  ;;  %1746 = vmatpush.bf16.msra.mxu3 %v3398_v10  ;;  %v2951_v7 = vld [vmem:[#allocation5 + $0x20] sm:$0xf0] }
  0x31   :  { %v3381_v14 = vld [vmem:[#allocation8 + $0x320] sm:$0xf]  ;;  %v4375_v15 = vld [vmem:[#allocation8 + $0x32c] sm:$0xf0]  ;;  %v3254_v20 = vor.u32 %v4343_v13, %v3253_v12  ;;  %1705 = vmatpush.bf16.msra.mxu0 %v2998_v16  ;;  %v4266_v8 = vld [vmem:[#allocation5 + $0xc] sm:$0xf]  ;;  %v4878_v10 = vor.u32 %v4265_v6, %v2951_v7 }
  0x32   :  { %v2981_v17 = vld [vmem:[#allocation8] sm:$0xf]  ;;  %v4275_v18 = vld [vmem:[#allocation8 + $0xc] sm:$0xf0]  ;;  %v3382_v24 = vor.u32 %v4375_v15, %v3381_v14  ;;  %1719 = vmatpush.bf16.msra.mxu1 %v3126_v19  ;;  %v2959_v11 = vld [vmem:[#allocation5 + $0x28] sm:$0xf0] }
  0x33   :  { %v3109_v21 = vld [vmem:[#allocation8 + $0x100] sm:$0xf]  ;;  %v4307_v22 = vld [vmem:[#allocation8 + $0x10c] sm:$0xf0]  ;;  %v2982_v31 = vor.u32 %v4275_v18, %v2981_v17  ;;  %1733 = vmatpush.bf16.msra.mxu2 %v3254_v20  ;;  %v4880_v17 = vor.u32 %v4266_v8, %v2959_v11 }
  0x34   :  { %v3237_v23 = vld [vmem:[#allocation8 + $0x200] sm:$0xf]  ;;  %v4339_v25 = vld [vmem:[#allocation8 + $0x20c] sm:$0xf0]  ;;  %v3110_v35 = vor.u32 %v4307_v22, %v3109_v21  ;;  %1747 = vmatpush.bf16.msra.mxu3 %v3382_v24 }
  0x35   :  { %v3365_v26 = vld [vmem:[#allocation8 + $0x300] sm:$0xf]  ;;  %v4371_v27 = vld [vmem:[#allocation8 + $0x30c] sm:$0xf0]  ;;  %v3238_v36 = vor.u32 %v4339_v25, %v3237_v23  ;;  %1706 = vmatpush.bf16.msra.mxu0 %v2982_v31 }
  0x36   :  { %v3605_v28 = vld [vmem:[#allocation8 + $0x4e0] sm:$0xf]  ;;  %v4431_v29 = vld [vmem:[#allocation8 + $0x4ec] sm:$0xf0]  ;;  %v3366_v39 = vor.u32 %v4371_v27, %v3365_v26  ;;  %1720 = vmatpush.bf16.msra.mxu1 %v3110_v35 }
  0x37   :  { %v3733_v30 = vld [vmem:[#allocation8 + $0x5e0] sm:$0xf]  ;;  %v4463_v32 = vld [vmem:[#allocation8 + $0x5ec] sm:$0xf0]  ;;  %v3606_v40 = vor.u32 %v4431_v29, %v3605_v28  ;;  %1734 = vmatpush.bf16.msra.mxu2 %v3238_v36 }
  0x38   :  { %v3861_v33 = vld [vmem:[#allocation8 + $0x6e0] sm:$0xf]  ;;  %v4495_v34 = vld [vmem:[#allocation8 + $0x6ec] sm:$0xf0]  ;;  %v3734_v43 = vor.u32 %v4463_v32, %v3733_v30  ;;  %1748 = vmatpush.bf16.msra.mxu3 %v3366_v39 }
  0x39   :  { %v3989_v37 = vld [vmem:[#allocation8 + $0x7e0] sm:$0xf]  ;;  %v4527_v38 = vld [vmem:[#allocation8 + $0x7ec] sm:$0xf0]  ;;  %v3862_v44 = vor.u32 %v4495_v34, %v3861_v33  ;;  %1755 = vmatpush.bf16.msrb.mxu0 %v3606_v40  ;;  %1721 = vmatmul.bf16.vlgmr.msra.gmra.mxu1 %v4878_v10 }
  0x3a   :  { %v3589_v41 = vld [vmem:[#allocation8 + $0x4c0] sm:$0xf]  ;;  %v4427_v42 = vld [vmem:[#allocation8 + $0x4cc] sm:$0xf0]  ;;  %v3990_v48 = vor.u32 %v4527_v38, %v3989_v37  ;;  %1769 = vmatpush.bf16.msrb.mxu1 %v3734_v43  ;;  %1735 = vmatmul.bf16.vlgmr.msra.gmra.mxu2 %v4874_v1 }
  0x3b   :  { %v3717_v45 = vld [vmem:[#allocation8 + $0x5c0] sm:$0xf]  ;;  %v4459_v46 = vld [vmem:[#allocation8 + $0x5cc] sm:$0xf0]  ;;  %v3590_v55 = vor.u32 %v4427_v42, %v3589_v41  ;;  %1783 = vmatpush.bf16.msrb.mxu2 %v3862_v44  ;;  %1749 = vmatmul.bf16.vlgmr.msra.gmra.mxu3 %v4880_v17 }
  0x3c   :  { %v3845_v47 = vld [vmem:[#allocation8 + $0x6c0] sm:$0xf]  ;;  %v4491_v49 = vld [vmem:[#allocation8 + $0x6cc] sm:$0xf0]  ;;  %v3718_v60 = vor.u32 %v4459_v46, %v3717_v45  ;;  %1797 = vmatpush.bf16.msrb.mxu3 %v3990_v48 }
  0x3d   :  { %v3973_v50 = vld [vmem:[#allocation8 + $0x7c0] sm:$0xf]  ;;  %v4523_v51 = vld [vmem:[#allocation8 + $0x7cc] sm:$0xf0]  ;;  %v3846_v61 = vor.u32 %v4491_v49, %v3845_v47  ;;  %1756 = vmatpush.bf16.msrb.mxu0 %v3590_v55 }
  0x3e   :  { %v2949_v52 = vld [vmem:[#allocation5] sm:$0xf]  ;;  %v4423_v57 = vld [vmem:[#allocation8 + $0x4ac] sm:$0xf0]  ;;  %v3974_v2 = vor.u32 %v4523_v51, %v3973_v50  ;;  %1770 = vmatpush.bf16.msrb.mxu1 %v3718_v60 }
  0x3f   :  { %v4269_v53 = vld [vmem:[#allocation5 + $0x1c] sm:$0xf0]  ;;  %v4455_v63 = vld [vmem:[#allocation8 + $0x5ac] sm:$0xf0]  ;;  %1784 = vmatpush.bf16.msrb.mxu2 %v3846_v61 }
  0x40   :  { %v3573_v56 = vld [vmem:[#allocation8 + $0x4a0] sm:$0xf]  ;;  %v4872_v58 = vor.u32 %v4269_v53, %v2949_v52  ;;  %v4487_v3 = vld [vmem:[#allocation8 + $0x6ac] sm:$0xf0]  ;;  %1798 = vmatpush.bf16.msrb.mxu3 %v3974_v2 }
  0x41   :  { %v3701_v62 = vld [vmem:[#allocation8 + $0x5a0] sm:$0xf]  ;;  %v4519_v5 = vld [vmem:[#allocation8 + $0x7ac] sm:$0xf0]  ;;  %v3574_v9 = vor.u32 %v4423_v57, %v3573_v56 }
  0x42   :  { %v3829_v0 = vld [vmem:[#allocation8 + $0x6a0] sm:$0xf]  ;;  %1707 = vmatmul.bf16.vlgmr.msra.gmra.mxu0 %v4872_v58  ;;  %v3702_v12 = vor.u32 %v4455_v63, %v3701_v62  ;;  %v4419_v15 = vld [vmem:[#allocation8 + $0x48c] sm:$0xf0] }
  0x43   :  { %v3957_v4 = vld [vmem:[#allocation8 + $0x7a0] sm:$0xf]  ;;  %v3830_v13 = vor.u32 %v4487_v3, %v3829_v0  ;;  %v4451_v19 = vld [vmem:[#allocation8 + $0x58c] sm:$0xf0]  ;;  %1757 = vmatpush.bf16.msrb.mxu0 %v3574_v9  ;;  %v4301_v9 = vld [vmem:[#allocation8 + $0xe4] sm:$0xf] }
  0x44   :  { %v3557_v14 = vld [vmem:[#allocation8 + $0x480] sm:$0xf]  ;;  %v3958_v18 = vor.u32 %v4519_v5, %v3957_v4  ;;  %v4483_v21 = vld [vmem:[#allocation8 + $0x68c] sm:$0xf0]  ;;  %1771 = vmatpush.bf16.msrb.mxu1 %v3702_v12  ;;  %v3095_v12 = vld [vmem:[#allocation8 + $0xf0] sm:$0xf0] }
  0x45   :  { %v3685_v16 = vld [vmem:[#allocation8 + $0x580] sm:$0xf]  ;;  %v4515_v23 = vld [vmem:[#allocation8 + $0x78c] sm:$0xf0]  ;;  %v3558_v24 = vor.u32 %v4419_v15, %v3557_v14  ;;  %1785 = vmatpush.bf16.msrb.mxu2 %v3830_v13  ;;  %v4333_v13 = vld [vmem:[#allocation8 + $0x1e4] sm:$0xf] }
  0x46   :  { %v3813_v20 = vld [vmem:[#allocation8 + $0x680] sm:$0xf]  ;;  %v3686_v25 = vor.u32 %v4451_v19, %v3685_v16  ;;  %v4415_v28 = vld [vmem:[#allocation8 + $0x46c] sm:$0xf0]  ;;  %1799 = vmatpush.bf16.msrb.mxu3 %v3958_v18  ;;  %v3223_v14 = vld [vmem:[#allocation8 + $0x1f0] sm:$0xf0] }
  0x47   :  { %v3941_v22 = vld [vmem:[#allocation8 + $0x780] sm:$0xf]  ;;  %v3814_v26 = vor.u32 %v4483_v21, %v3813_v20  ;;  %v4447_v31 = vld [vmem:[#allocation8 + $0x56c] sm:$0xf0]  ;;  %1758 = vmatpush.bf16.msrb.mxu0 %v3558_v24  ;;  %v4365_v15 = vld [vmem:[#allocation8 + $0x2e4] sm:$0xf] }
  0x48   :  { %v3541_v27 = vld [vmem:[#allocation8 + $0x460] sm:$0xf]  ;;  %v3942_v30 = vor.u32 %v4515_v23, %v3941_v22  ;;  %v4479_v33 = vld [vmem:[#allocation8 + $0x66c] sm:$0xf0]  ;;  %1772 = vmatpush.bf16.msrb.mxu1 %v3686_v25  ;;  %v3351_v16 = vld [vmem:[#allocation8 + $0x2f0] sm:$0xf0] }
  0x49   :  { %v3669_v29 = vld [vmem:[#allocation8 + $0x560] sm:$0xf]  ;;  %v4511_v35 = vld [vmem:[#allocation8 + $0x76c] sm:$0xf0]  ;;  %v3542_v36 = vor.u32 %v4415_v28, %v3541_v27  ;;  %1786 = vmatpush.bf16.msrb.mxu2 %v3814_v26  ;;  %v4397_v18 = vld [vmem:[#allocation8 + $0x3e4] sm:$0xf] }
  0x4a   :  { %v3797_v32 = vld [vmem:[#allocation8 + $0x660] sm:$0xf]  ;;  %v3670_v37 = vor.u32 %v4447_v31, %v3669_v29  ;;  %v4411_v40 = vld [vmem:[#allocation8 + $0x44c] sm:$0xf0]  ;;  %1800 = vmatpush.bf16.msrb.mxu3 %v3942_v30  ;;  %v3479_v20 = vld [vmem:[#allocation8 + $0x3f0] sm:$0xf0]  ;;  %v3098_v29 = vor.u32 %v4301_v9, %v3095_v12 }
  0x4b   :  { %v3925_v34 = vld [vmem:[#allocation8 + $0x760] sm:$0xf]  ;;  %v3798_v38 = vor.u32 %v4479_v33, %v3797_v32  ;;  %v4443_v43 = vld [vmem:[#allocation8 + $0x54c] sm:$0xf0]  ;;  %1759 = vmatpush.bf16.msrb.mxu0 %v3542_v36  ;;  %v2973_v25 = vld [vmem:[#allocation5 + $0x18] sm:$0xf]  ;;  %v3226_v33 = vor.u32 %v4333_v13, %v3223_v14 }
  0x4c   :  { %v3525_v39 = vld [vmem:[#allocation8 + $0x440] sm:$0xf]  ;;  %v3926_v42 = vor.u32 %v4511_v35, %v3925_v34  ;;  %v4475_v45 = vld [vmem:[#allocation8 + $0x64c] sm:$0xf0]  ;;  %1773 = vmatpush.bf16.msrb.mxu1 %v3670_v37  ;;  %v4272_v26 = vld [vmem:[#allocation5 + $0x34] sm:$0xf0]  ;;  %v3354_v34 = vor.u32 %v4365_v15, %v3351_v16 }
  0x4d   :  { %v3653_v41 = vld [vmem:[#allocation8 + $0x540] sm:$0xf]  ;;  %v4507_v47 = vld [vmem:[#allocation8 + $0x74c] sm:$0xf0]  ;;  %v3526_v48 = vor.u32 %v4411_v40, %v3525_v39  ;;  %1787 = vmatpush.bf16.msrb.mxu2 %v3798_v38  ;;  %v4267_v27 = vld [vmem:[#allocation5 + $0x14] sm:$0xf]  ;;  %v3482_v38 = vor.u32 %v4397_v18, %v3479_v20 }
  0x4e   :  { %v3781_v44 = vld [vmem:[#allocation8 + $0x640] sm:$0xf]  ;;  %v3654_v50 = vor.u32 %v4443_v43, %v3653_v41  ;;  %v4407_v52 = vld [vmem:[#allocation8 + $0x42c] sm:$0xf0]  ;;  %1801 = vmatpush.bf16.msrb.mxu3 %v3926_v42  ;;  %v2967_v30 = vld [vmem:[#allocation5 + $0x30] sm:$0xf0]  ;;  %v4886_v43 = vor.u32 %v4272_v26, %v2973_v25 }
  0x4f   :  { %v3909_v46 = vld [vmem:[#allocation8 + $0x740] sm:$0xf]  ;;  %v3782_v51 = vor.u32 %v4475_v45, %v3781_v44  ;;  %v4439_v54 = vld [vmem:[#allocation8 + $0x52c] sm:$0xf0]  ;;  %1760 = vmatpush.bf16.msrb.mxu0 %v3526_v48  ;;  %v4268_v31 = vld [vmem:[#allocation5 + $0x1c] sm:$0xf]  ;;  %v4888_v44 = vor.u32 %v4267_v27, %v2967_v30 }
  0x50   :  { %v3509_v49 = vld [vmem:[#allocation8 + $0x420] sm:$0xf]  ;;  %v3910_v55 = vor.u32 %v4507_v47, %v3909_v46  ;;  %v4471_v57 = vld [vmem:[#allocation8 + $0x62c] sm:$0xf0]  ;;  %1774 = vmatpush.bf16.msrb.mxu1 %v3654_v50  ;;  %v2975_v32 = vld [vmem:[#allocation5 + $0x38] sm:$0xf0] }
  0x51   :  { %v3637_v53 = vld [vmem:[#allocation8 + $0x520] sm:$0xf]  ;;  %v4503_v60 = vld [vmem:[#allocation8 + $0x72c] sm:$0xf0]  ;;  %v3510_v63 = vor.u32 %v4407_v52, %v3509_v49  ;;  %1788 = vmatpush.bf16.msrb.mxu2 %v3782_v51  ;;  %v4297_v35 = vld [vmem:[#allocation8 + $0xc4] sm:$0xf]  ;;  %v4890_v47 = vor.u32 %v4268_v31, %v2975_v32 }
  0x52   :  { %v3765_v56 = vld [vmem:[#allocation8 + $0x620] sm:$0xf]  ;;  %v4403_v62 = vld [vmem:[#allocation8 + $0x40c] sm:$0xf0]  ;;  %v3638_v5 = vor.u32 %v4439_v54, %v3637_v53  ;;  %1802 = vmatpush.bf16.msrb.mxu3 %v3910_v55  ;;  %v3079_v36 = vld [vmem:[#allocation8 + $0xd0] sm:$0xf0] }
  0x53   :  { %v3893_v59 = vld [vmem:[#allocation8 + $0x720] sm:$0xf]  ;;  %v4435_v2 = vld [vmem:[#allocation8 + $0x50c] sm:$0xf0]  ;;  %v3766_v6 = vor.u32 %v4471_v57, %v3765_v56  ;;  %1761 = vmatpush.bf16.msrb.mxu0 %v3510_v63  ;;  %v4329_v37 = vld [vmem:[#allocation8 + $0x1c4] sm:$0xf]  ;;  %v3082_v48 = vor.u32 %v4297_v35, %v3079_v36 }
  0x54   :  { %v3493_v61 = vld [vmem:[#allocation8 + $0x400] sm:$0xf]  ;;  %v4467_v4 = vld [vmem:[#allocation8 + $0x60c] sm:$0xf0]  ;;  %v3894_v11 = vor.u32 %v4503_v60, %v3893_v59  ;;  %1775 = vmatpush.bf16.msrb.mxu1 %v3638_v5  ;;  %v3207_v40 = vld [vmem:[#allocation8 + $0x1d0] sm:$0xf0] }
  0x55   :  { %v3621_v0 = vld [vmem:[#allocation8 + $0x500] sm:$0xf]  ;;  %v4499_v8 = vld [vmem:[#allocation8 + $0x70c] sm:$0xf0]  ;;  %v3494_v19 = vor.u32 %v4403_v62, %v3493_v61  ;;  %1789 = vmatpush.bf16.msrb.mxu2 %v3766_v6  ;;  %v4361_v41 = vld [vmem:[#allocation8 + $0x2c4] sm:$0xf]  ;;  %v3210_v49 = vor.u32 %v4329_v37, %v3207_v40 }
  0x56   :  { %v3749_v3 = vld [vmem:[#allocation8 + $0x600] sm:$0xf]  ;;  %v2965_v21 = vld [vmem:[#allocation5 + $0x10] sm:$0xf]  ;;  %v3622_v23 = vor.u32 %v4435_v2, %v3621_v0  ;;  %1803 = vmatpush.bf16.msrb.mxu3 %v3894_v11  ;;  %v3335_v42 = vld [vmem:[#allocation8 + $0x2d0] sm:$0xf0] }
  0x57   :  { %v3877_v7 = vld [vmem:[#allocation8 + $0x700] sm:$0xf]  ;;  %v4271_v22 = vld [vmem:[#allocation5 + $0x2c] sm:$0xf0]  ;;  %v3750_v24 = vor.u32 %v4467_v4, %v3749_v3  ;;  %1762 = vmatpush.bf16.msrb.mxu0 %v3494_v19  ;;  %v4393_v45 = vld [vmem:[#allocation8 + $0x3c4] sm:$0xf]  ;;  %v3338_v50 = vor.u32 %v4361_v41, %v3335_v42 }
  0x58   :  { %v3878_v28 = vor.u32 %v4499_v8, %v3877_v7  ;;  %v4884_v39 = vor.u32 %v4271_v22, %v2965_v21  ;;  %1776 = vmatpush.bf16.msrb.mxu1 %v3622_v23  ;;  %v3463_v46 = vld [vmem:[#allocation8 + $0x3d0] sm:$0xf0]  ;;  %v4293_v51 = vld [vmem:[#allocation8 + $0xa4] sm:$0xf] }
  0x59   :  { %1790 = vmatpush.bf16.msrb.mxu2 %v3750_v24  ;;  %v3063_v52 = vld [vmem:[#allocation8 + $0xb0] sm:$0xf0]  ;;  %v4325_v53 = vld [vmem:[#allocation8 + $0x1a4] sm:$0xf]  ;;  %v3466_v54 = vor.u32 %v4393_v45, %v3463_v46 }
  0x5a   :  { %1804 = vmatpush.bf16.msrb.mxu3 %v3878_v28  ;;  %1763 = vmatmul.bf16.vlgmr.msrb.gmra.mxu0 %v4884_v39  ;;  %v3191_v55 = vld [vmem:[#allocation8 + $0x1b0] sm:$0xf0]  ;;  %v4357_v56 = vld [vmem:[#allocation8 + $0x2a4] sm:$0xf]  ;;  %v3066_v61 = vor.u32 %v4293_v51, %v3063_v52 }
  0x5b   :  { %1811 = vmatpush.bf16.msra.mxu0 %v3098_v29  ;;  %v3319_v57 = vld [vmem:[#allocation8 + $0x2b0] sm:$0xf0]  ;;  %1777 = vmatmul.bf16.vlgmr.msrb.gmra.mxu1 %v4888_v44  ;;  %v4389_v59 = vld [vmem:[#allocation8 + $0x3a4] sm:$0xf]  ;;  %v3194_v62 = vor.u32 %v4325_v53, %v3191_v55 }
  0x5c   :  { %1825 = vmatpush.bf16.msra.mxu1 %v3226_v33  ;;  %1791 = vmatmul.bf16.vlgmr.msrb.gmra.mxu2 %v4886_v43  ;;  %v3447_v60 = vld [vmem:[#allocation8 + $0x3b0] sm:$0xf0]  ;;  %v3322_v63 = vor.u32 %v4357_v56, %v3319_v57  ;;  %v4289_v0 = vld [vmem:[#allocation8 + $0x84] sm:$0xf] }
  0x5d   :  { %1839 = vmatpush.bf16.msra.mxu2 %v3354_v34  ;;  %1805 = vmatmul.bf16.vlgmr.msrb.gmra.mxu3 %v4890_v47  ;;  %v3047_v2 = vld [vmem:[#allocation8 + $0x90] sm:$0xf0]  ;;  %v4321_v3 = vld [vmem:[#allocation8 + $0x184] sm:$0xf]  ;;  %v3450_v4 = vor.u32 %v4389_v59, %v3447_v60 }
  0x5e   :  { %1853 = vmatpush.bf16.msra.mxu3 %v3482_v38  ;;  %v3175_v5 = vld [vmem:[#allocation8 + $0x190] sm:$0xf0]  ;;  %v4353_v6 = vld [vmem:[#allocation8 + $0x284] sm:$0xf]  ;;  %v3050_v11 = vor.u32 %v4289_v0, %v3047_v2 }
  0x5f   :  { %1812 = vmatpush.bf16.msra.mxu0 %v3082_v48  ;;  %v3303_v7 = vld [vmem:[#allocation8 + $0x290] sm:$0xf0]  ;;  %v4385_v8 = vld [vmem:[#allocation8 + $0x384] sm:$0xf]  ;;  %v3178_v12 = vor.u32 %v4321_v3, %v3175_v5 }
  0x60   :  { %1826 = vmatpush.bf16.msra.mxu1 %v3210_v49  ;;  %v3431_v9 = vld [vmem:[#allocation8 + $0x390] sm:$0xf0]  ;;  %v3306_v13 = vor.u32 %v4353_v6, %v3303_v7  ;;  %v4285_v14 = vld [vmem:[#allocation8 + $0x64] sm:$0xf] }
  0x61   :  { %1840 = vmatpush.bf16.msra.mxu2 %v3338_v50  ;;  %v3031_v15 = vld [vmem:[#allocation8 + $0x70] sm:$0xf0]  ;;  %v4317_v16 = vld [vmem:[#allocation8 + $0x164] sm:$0xf]  ;;  %v3434_v18 = vor.u32 %v4385_v8, %v3431_v9 }
  0x62   :  { %1854 = vmatpush.bf16.msra.mxu3 %v3466_v54  ;;  %v3159_v19 = vld [vmem:[#allocation8 + $0x170] sm:$0xf0]  ;;  %v4349_v20 = vld [vmem:[#allocation8 + $0x264] sm:$0xf]  ;;  %v3034_v24 = vor.u32 %v4285_v14, %v3031_v15 }
  0x63   :  { %1813 = vmatpush.bf16.msra.mxu0 %v3066_v61  ;;  %v3287_v21 = vld [vmem:[#allocation8 + $0x270] sm:$0xf0]  ;;  %v4381_v22 = vld [vmem:[#allocation8 + $0x364] sm:$0xf]  ;;  %v3162_v25 = vor.u32 %v4317_v16, %v3159_v19 }
  0x64   :  { %1827 = vmatpush.bf16.msra.mxu1 %v3194_v62  ;;  %v3415_v23 = vld [vmem:[#allocation8 + $0x370] sm:$0xf0]  ;;  %v3290_v26 = vor.u32 %v4349_v20, %v3287_v21  ;;  %v4281_v27 = vld [vmem:[#allocation8 + $0x44] sm:$0xf] }
  0x65   :  { %1841 = vmatpush.bf16.msra.mxu2 %v3322_v63  ;;  %v3015_v28 = vld [vmem:[#allocation8 + $0x50] sm:$0xf0]  ;;  %v4313_v29 = vld [vmem:[#allocation8 + $0x144] sm:$0xf]  ;;  %v3418_v30 = vor.u32 %v4381_v22, %v3415_v23 }
  0x66   :  { %1855 = vmatpush.bf16.msra.mxu3 %v3450_v4  ;;  %v3143_v31 = vld [vmem:[#allocation8 + $0x150] sm:$0xf0]  ;;  %v4345_v32 = vld [vmem:[#allocation8 + $0x244] sm:$0xf]  ;;  %v3018_v36 = vor.u32 %v4281_v27, %v3015_v28 }
  0x67   :  { %1814 = vmatpush.bf16.msra.mxu0 %v3050_v11  ;;  %v3271_v33 = vld [vmem:[#allocation8 + $0x250] sm:$0xf0]  ;;  %v4377_v34 = vld [vmem:[#allocation8 + $0x344] sm:$0xf]  ;;  %v3146_v37 = vor.u32 %v4313_v29, %v3143_v31 }
  0x68   :  { %1828 = vmatpush.bf16.msra.mxu1 %v3178_v12  ;;  %v3399_v35 = vld [vmem:[#allocation8 + $0x350] sm:$0xf0]  ;;  %v3274_v38 = vor.u32 %v4345_v32, %v3271_v33  ;;  %v4277_v40 = vld [vmem:[#allocation8 + $0x24] sm:$0xf] }
  0x69   :  { %1842 = vmatpush.bf16.msra.mxu2 %v3306_v13  ;;  %v2999_v41 = vld [vmem:[#allocation8 + $0x30] sm:$0xf0]  ;;  %v4309_v42 = vld [vmem:[#allocation8 + $0x124] sm:$0xf]  ;;  %v3402_v45 = vor.u32 %v4377_v34, %v3399_v35 }
  0x6a   :  { %1856 = vmatpush.bf16.msra.mxu3 %v3434_v18  ;;  %v3127_v46 = vld [vmem:[#allocation8 + $0x130] sm:$0xf0]  ;;  %v4341_v48 = vld [vmem:[#allocation8 + $0x224] sm:$0xf]  ;;  %v3002_v52 = vor.u32 %v4277_v40, %v2999_v41 }
  0x6b   :  { %1815 = vmatpush.bf16.msra.mxu0 %v3034_v24  ;;  %v3255_v49 = vld [vmem:[#allocation8 + $0x230] sm:$0xf0]  ;;  %v4373_v50 = vld [vmem:[#allocation8 + $0x324] sm:$0xf]  ;;  %v3130_v55 = vor.u32 %v4309_v42, %v3127_v46 }
  0x6c   :  { %1829 = vmatpush.bf16.msra.mxu1 %v3162_v25  ;;  %v3383_v51 = vld [vmem:[#allocation8 + $0x330] sm:$0xf0]  ;;  %v4273_v53 = vld [vmem:[#allocation8 + $0x4] sm:$0xf]  ;;  %v3258_v56 = vor.u32 %v4341_v48, %v3255_v49 }
  0x6d   :  { %1843 = vmatpush.bf16.msra.mxu2 %v3290_v26  ;;  %v2983_v54 = vld [vmem:[#allocation8 + $0x10] sm:$0xf0]  ;;  %v4305_v57 = vld [vmem:[#allocation8 + $0x104] sm:$0xf]  ;;  %v3386_v61 = vor.u32 %v4373_v50, %v3383_v51 }
  0x6e   :  { %1857 = vmatpush.bf16.msra.mxu3 %v3418_v30  ;;  %v3111_v59 = vld [vmem:[#allocation8 + $0x110] sm:$0xf0]  ;;  %v4337_v60 = vld [vmem:[#allocation8 + $0x204] sm:$0xf]  ;;  %v2986_v5 = vor.u32 %v4273_v53, %v2983_v54 }
  0x6f   :  { %1816 = vmatpush.bf16.msra.mxu0 %v3018_v36  ;;  %v3239_v62 = vld [vmem:[#allocation8 + $0x210] sm:$0xf0]  ;;  %v4369_v63 = vld [vmem:[#allocation8 + $0x304] sm:$0xf]  ;;  %v3114_v9 = vor.u32 %v4305_v57, %v3111_v59 }
  0x70   :  { %1830 = vmatpush.bf16.msra.mxu1 %v3146_v37  ;;  %v3367_v0 = vld [vmem:[#allocation8 + $0x310] sm:$0xf0]  ;;  %v4429_v2 = vld [vmem:[#allocation8 + $0x4e4] sm:$0xf]  ;;  %v3242_v11 = vor.u32 %v4337_v60, %v3239_v62 }
  0x71   :  { %1844 = vmatpush.bf16.msra.mxu2 %v3274_v38  ;;  %v3607_v3 = vld [vmem:[#allocation8 + $0x4f0] sm:$0xf0]  ;;  %v4461_v4 = vld [vmem:[#allocation8 + $0x5e4] sm:$0xf]  ;;  %v3370_v14 = vor.u32 %v4369_v63, %v3367_v0 }
  0x72   :  { %1858 = vmatpush.bf16.msra.mxu3 %v3402_v45  ;;  %v3735_v6 = vld [vmem:[#allocation8 + $0x5f0] sm:$0xf0]  ;;  %v4493_v7 = vld [vmem:[#allocation8 + $0x6e4] sm:$0xf]  ;;  %v3610_v15 = vor.u32 %v4429_v2, %v3607_v3 }
  0x73   :  { %1817 = vmatpush.bf16.msra.mxu0 %v3002_v52  ;;  %v3863_v8 = vld [vmem:[#allocation8 + $0x6f0] sm:$0xf0]  ;;  %v4525_v12 = vld [vmem:[#allocation8 + $0x7e4] sm:$0xf]  ;;  %v3738_v16 = vor.u32 %v4461_v4, %v3735_v6 }
  0x74   :  { %1831 = vmatpush.bf16.msra.mxu1 %v3130_v55  ;;  %v3991_v13 = vld [vmem:[#allocation8 + $0x7f0] sm:$0xf0]  ;;  %v3866_v18 = vor.u32 %v4493_v7, %v3863_v8  ;;  %v4425_v19 = vld [vmem:[#allocation8 + $0x4c4] sm:$0xf] }
  0x75   :  { %1845 = vmatpush.bf16.msra.mxu2 %v3258_v56  ;;  %v3591_v20 = vld [vmem:[#allocation8 + $0x4d0] sm:$0xf0]  ;;  %v4457_v21 = vld [vmem:[#allocation8 + $0x5c4] sm:$0xf]  ;;  %v3994_v22 = vor.u32 %v4525_v12, %v3991_v13 }
  0x76   :  { %1859 = vmatpush.bf16.msra.mxu3 %v3386_v61  ;;  %v3719_v23 = vld [vmem:[#allocation8 + $0x5d0] sm:$0xf0]  ;;  %v4489_v24 = vld [vmem:[#allocation8 + $0x6c4] sm:$0xf]  ;;  %v3594_v28 = vor.u32 %v4425_v19, %v3591_v20 }
  0x77   :  { %1818 = vmatpush.bf16.msra.mxu0 %v2986_v5  ;;  %v3847_v25 = vld [vmem:[#allocation8 + $0x6d0] sm:$0xf0]  ;;  %v4521_v26 = vld [vmem:[#allocation8 + $0x7c4] sm:$0xf]  ;;  %v3722_v29 = vor.u32 %v4457_v21, %v3719_v23 }
  0x78   :  { %1832 = vmatpush.bf16.msra.mxu1 %v3114_v9  ;;  %v3975_v27 = vld [vmem:[#allocation8 + $0x7d0] sm:$0xf0]  ;;  %v3850_v30 = vor.u32 %v4489_v24, %v3847_v25  ;;  %v4421_v31 = vld [vmem:[#allocation8 + $0x4a4] sm:$0xf] }
  0x79   :  { %1846 = vmatpush.bf16.msra.mxu2 %v3242_v11  ;;  %v3575_v32 = vld [vmem:[#allocation8 + $0x4b0] sm:$0xf0]  ;;  %v4453_v33 = vld [vmem:[#allocation8 + $0x5a4] sm:$0xf]  ;;  %v3978_v34 = vor.u32 %v4521_v26, %v3975_v27 }
  0x7a   :  { %1860 = vmatpush.bf16.msra.mxu3 %v3370_v14  ;;  %v3703_v35 = vld [vmem:[#allocation8 + $0x5b0] sm:$0xf0]  ;;  %v4485_v36 = vld [vmem:[#allocation8 + $0x6a4] sm:$0xf]  ;;  %1819 = vmatmul.bf16.vlgmr.msra.gmra.mxu0 %v4872_v58  ;;  %v3578_v41 = vor.u32 %v4421_v31, %v3575_v32 }
  0x7b   :  { %1867 = vmatpush.bf16.msrb.mxu0 %v3610_v15  ;;  %v3831_v37 = vld [vmem:[#allocation8 + $0x6b0] sm:$0xf0]  ;;  %v4517_v38 = vld [vmem:[#allocation8 + $0x7a4] sm:$0xf]  ;;  %1833 = vmatmul.bf16.vlgmr.msra.gmra.mxu1 %v4878_v10  ;;  %v3706_v42 = vor.u32 %v4453_v33, %v3703_v35 }
  0x7c   :  { %1881 = vmatpush.bf16.msrb.mxu1 %v3738_v16  ;;  %v3959_v40 = vld [vmem:[#allocation8 + $0x7b0] sm:$0xf0]  ;;  %1847 = vmatmul.bf16.vlgmr.msra.gmra.mxu2 %v4874_v1  ;;  %v3834_v45 = vor.u32 %v4485_v36, %v3831_v37  ;;  %v4417_v46 = vld [vmem:[#allocation8 + $0x484] sm:$0xf] }
  0x7d   :  { %1895 = vmatpush.bf16.msrb.mxu2 %v3866_v18  ;;  %1861 = vmatmul.bf16.vlgmr.msra.gmra.mxu3 %v4880_v17  ;;  %v3559_v48 = vld [vmem:[#allocation8 + $0x490] sm:$0xf0]  ;;  %v4449_v49 = vld [vmem:[#allocation8 + $0x584] sm:$0xf]  ;;  %v3962_v50 = vor.u32 %v4517_v38, %v3959_v40 }
  0x7e   :  { %1909 = vmatpush.bf16.msrb.mxu3 %v3994_v22  ;;  %v3687_v51 = vld [vmem:[#allocation8 + $0x590] sm:$0xf0]  ;;  %v4481_v52 = vld [vmem:[#allocation8 + $0x684] sm:$0xf]  ;;  %v3562_v56 = vor.u32 %v4417_v46, %v3559_v48  ;;  %v3101_v48 = vld [vmem:[#allocation8 + $0xe8] sm:$0xf] }
  0x7f   :  { %1868 = vmatpush.bf16.msrb.mxu0 %v3594_v28  ;;  %v3815_v53 = vld [vmem:[#allocation8 + $0x690] sm:$0xf0]  ;;  %v4513_v54 = vld [vmem:[#allocation8 + $0x784] sm:$0xf]  ;;  %v3690_v57 = vor.u32 %v4449_v49, %v3687_v51  ;;  %v4304_v49 = vld [vmem:[#allocation8 + $0xf4] sm:$0xf0] }
  0x80   :  { %1882 = vmatpush.bf16.msrb.mxu1 %v3722_v29  ;;  %v3943_v55 = vld [vmem:[#allocation8 + $0x790] sm:$0xf0]  ;;  %v3818_v59 = vor.u32 %v4481_v52, %v3815_v53  ;;  %v4413_v60 = vld [vmem:[#allocation8 + $0x464] sm:$0xf]  ;;  %v4336_v52 = vld [vmem:[#allocation8 + $0x1f4] sm:$0xf0] }
  0x81   :  { %1896 = vmatpush.bf16.msrb.mxu2 %v3850_v30  ;;  %v3543_v61 = vld [vmem:[#allocation8 + $0x470] sm:$0xf0]  ;;  %v4445_v62 = vld [vmem:[#allocation8 + $0x564] sm:$0xf]  ;;  %v3946_v63 = vor.u32 %v4513_v54, %v3943_v55  ;;  %v3357_v53 = vld [vmem:[#allocation8 + $0x2e8] sm:$0xf] }
  0x82   :  { %1910 = vmatpush.bf16.msrb.mxu3 %v3978_v34  ;;  %v3671_v0 = vld [vmem:[#allocation8 + $0x570] sm:$0xf0]  ;;  %v4477_v2 = vld [vmem:[#allocation8 + $0x664] sm:$0xf]  ;;  %v3546_v6 = vor.u32 %v4413_v60, %v3543_v61  ;;  %v4368_v54 = vld [vmem:[#allocation8 + $0x2f4] sm:$0xf0]  ;;  %v3102_v61 = vor.u32 %v4304_v49, %v3101_v48 }
  0x83   :  { %1869 = vmatpush.bf16.msrb.mxu0 %v3578_v41  ;;  %v3799_v3 = vld [vmem:[#allocation8 + $0x670] sm:$0xf0]  ;;  %v4509_v4 = vld [vmem:[#allocation8 + $0x764] sm:$0xf]  ;;  %v3674_v7 = vor.u32 %v4445_v62, %v3671_v0  ;;  %v3085_v0 = vld [vmem:[#allocation8 + $0xc8] sm:$0xf] }
  0x84   :  { %1883 = vmatpush.bf16.msrb.mxu1 %v3706_v42  ;;  %v3927_v5 = vld [vmem:[#allocation8 + $0x770] sm:$0xf0]  ;;  %v3802_v8 = vor.u32 %v4477_v2, %v3799_v3  ;;  %v4409_v9 = vld [vmem:[#allocation8 + $0x444] sm:$0xf]  ;;  %v4300_v2 = vld [vmem:[#allocation8 + $0xd4] sm:$0xf0] }
  0x85   :  { %1897 = vmatpush.bf16.msrb.mxu2 %v3834_v45  ;;  %v3527_v11 = vld [vmem:[#allocation8 + $0x450] sm:$0xf0]  ;;  %v4441_v12 = vld [vmem:[#allocation8 + $0x544] sm:$0xf]  ;;  %v3930_v13 = vor.u32 %v4509_v4, %v3927_v5  ;;  %v3213_v3 = vld [vmem:[#allocation8 + $0x1c8] sm:$0xf] }
  0x86   :  { %1911 = vmatpush.bf16.msrb.mxu3 %v3962_v50  ;;  %v3655_v14 = vld [vmem:[#allocation8 + $0x550] sm:$0xf0]  ;;  %v4473_v15 = vld [vmem:[#allocation8 + $0x644] sm:$0xf]  ;;  %v3530_v20 = vor.u32 %v4409_v9, %v3527_v11  ;;  %v3229_v50 = vld [vmem:[#allocation8 + $0x1e8] sm:$0xf]  ;;  %v3086_v11 = vor.u32 %v4300_v2, %v3085_v0 }
  0x87   :  { %1870 = vmatpush.bf16.msrb.mxu0 %v3562_v56  ;;  %v3783_v16 = vld [vmem:[#allocation8 + $0x650] sm:$0xf0]  ;;  %v4505_v18 = vld [vmem:[#allocation8 + $0x744] sm:$0xf]  ;;  %v3658_v21 = vor.u32 %v4441_v12, %v3655_v14  ;;  %v3230_v62 = vor.u32 %v4336_v52, %v3229_v50  ;;  %v4332_v5 = vld [vmem:[#allocation8 + $0x1d4] sm:$0xf0] }
  0x88   :  { %1884 = vmatpush.bf16.msrb.mxu1 %v3690_v57  ;;  %v3911_v19 = vld [vmem:[#allocation8 + $0x750] sm:$0xf0]  ;;  %v3786_v22 = vor.u32 %v4473_v15, %v3783_v16  ;;  %v4405_v23 = vld [vmem:[#allocation8 + $0x424] sm:$0xf]  ;;  %v3485_v57 = vld [vmem:[#allocation8 + $0x3e8] sm:$0xf]  ;;  %v3214_v12 = vor.u32 %v4332_v5, %v3213_v3 }
  0x89   :  { %1898 = vmatpush.bf16.msrb.mxu2 %v3818_v59  ;;  %v3511_v24 = vld [vmem:[#allocation8 + $0x430] sm:$0xf0]  ;;  %v4437_v25 = vld [vmem:[#allocation8 + $0x524] sm:$0xf]  ;;  %v3914_v26 = vor.u32 %v4505_v18, %v3911_v19  ;;  %v4400_v59 = vld [vmem:[#allocation8 + $0x3f4] sm:$0xf0] }
  0x8a   :  { %1912 = vmatpush.bf16.msrb.mxu3 %v3946_v63  ;;  %v3639_v27 = vld [vmem:[#allocation8 + $0x530] sm:$0xf0]  ;;  %v4469_v28 = vld [vmem:[#allocation8 + $0x624] sm:$0xf]  ;;  %v3514_v32 = vor.u32 %v4405_v23, %v3511_v24  ;;  %v3358_v63 = vor.u32 %v4368_v54, %v3357_v53  ;;  %v3486_v4 = vor.u32 %v4400_v59, %v3485_v57  ;;  %v4396_v9 = vld [vmem:[#allocation8 + $0x3d4] sm:$0xf0] }
  0x8b   :  { %1871 = vmatpush.bf16.msrb.mxu0 %v3546_v6  ;;  %v3767_v29 = vld [vmem:[#allocation8 + $0x630] sm:$0xf0]  ;;  %v4501_v30 = vld [vmem:[#allocation8 + $0x724] sm:$0xf]  ;;  %v3642_v35 = vor.u32 %v4437_v25, %v3639_v27  ;;  %v3341_v6 = vld [vmem:[#allocation8 + $0x2c8] sm:$0xf] }
  0x8c   :  { %1885 = vmatpush.bf16.msrb.mxu1 %v3674_v7  ;;  %v3895_v31 = vld [vmem:[#allocation8 + $0x730] sm:$0xf0]  ;;  %v4401_v33 = vld [vmem:[#allocation8 + $0x404] sm:$0xf]  ;;  %v3770_v36 = vor.u32 %v4469_v28, %v3767_v29  ;;  %v4364_v7 = vld [vmem:[#allocation8 + $0x2d4] sm:$0xf0] }
  0x8d   :  { %1899 = vmatpush.bf16.msrb.mxu2 %v3802_v8  ;;  %v3495_v34 = vld [vmem:[#allocation8 + $0x410] sm:$0xf0]  ;;  %v4433_v37 = vld [vmem:[#allocation8 + $0x504] sm:$0xf]  ;;  %v3898_v41 = vor.u32 %v4501_v30, %v3895_v31  ;;  %v3469_v8 = vld [vmem:[#allocation8 + $0x3c8] sm:$0xf] }
  0x8e   :  { %1913 = vmatpush.bf16.msrb.mxu3 %v3930_v13  ;;  %v3623_v38 = vld [vmem:[#allocation8 + $0x510] sm:$0xf0]  ;;  %v4465_v40 = vld [vmem:[#allocation8 + $0x604] sm:$0xf]  ;;  %v3498_v51 = vor.u32 %v4401_v33, %v3495_v34  ;;  %v3342_v13 = vor.u32 %v4364_v7, %v3341_v6  ;;  %v3069_v14 = vld [vmem:[#allocation8 + $0xa8] sm:$0xf]  ;;  %v3470_v18 = vor.u32 %v4396_v9, %v3469_v8 }
  0x8f   :  { %1872 = vmatpush.bf16.msrb.mxu0 %v3530_v20  ;;  %v3751_v42 = vld [vmem:[#allocation8 + $0x610] sm:$0xf0]  ;;  %v4497_v45 = vld [vmem:[#allocation8 + $0x704] sm:$0xf]  ;;  %v3626_v55 = vor.u32 %v4433_v37, %v3623_v38  ;;  %v4296_v15 = vld [vmem:[#allocation8 + $0xb4] sm:$0xf0] }
  0x90   :  { %1886 = vmatpush.bf16.msrb.mxu1 %v3658_v21  ;;  %v3879_v46 = vld [vmem:[#allocation8 + $0x710] sm:$0xf0]  ;;  %v3754_v56 = vor.u32 %v4465_v40, %v3751_v42  ;;  %v3197_v16 = vld [vmem:[#allocation8 + $0x1a8] sm:$0xf]  ;;  %v4328_v19 = vld [vmem:[#allocation8 + $0x1b4] sm:$0xf0]  ;;  %v3070_v24 = vor.u32 %v4296_v15, %v3069_v14 }
  0x91   :  { %1900 = vmatpush.bf16.msrb.mxu2 %v3786_v22  ;;  %v3882_v60 = vor.u32 %v4497_v45, %v3879_v46  ;;  %v3325_v20 = vld [vmem:[#allocation8 + $0x2a8] sm:$0xf]  ;;  %v4360_v21 = vld [vmem:[#allocation8 + $0x2b4] sm:$0xf0]  ;;  %v3198_v25 = vor.u32 %v4328_v19, %v3197_v16 }
  0x92   :  { %1914 = vmatpush.bf16.msrb.mxu3 %v3914_v26  ;;  %v3453_v22 = vld [vmem:[#allocation8 + $0x3a8] sm:$0xf]  ;;  %v4392_v23 = vld [vmem:[#allocation8 + $0x3b4] sm:$0xf0]  ;;  %v3326_v26 = vor.u32 %v4360_v21, %v3325_v20 }
  0x93   :  { %1873 = vmatpush.bf16.msrb.mxu0 %v3514_v32  ;;  %v3053_v27 = vld [vmem:[#allocation8 + $0x88] sm:$0xf]  ;;  %v4292_v28 = vld [vmem:[#allocation8 + $0x94] sm:$0xf0]  ;;  %v3454_v30 = vor.u32 %v4392_v23, %v3453_v22 }
  0x94   :  { %1887 = vmatpush.bf16.msrb.mxu1 %v3642_v35  ;;  %v3181_v29 = vld [vmem:[#allocation8 + $0x188] sm:$0xf]  ;;  %v4324_v31 = vld [vmem:[#allocation8 + $0x194] sm:$0xf0] }
  0x95   :  { %1901 = vmatpush.bf16.msrb.mxu2 %v3770_v36  ;;  %v3309_v32 = vld [vmem:[#allocation8 + $0x288] sm:$0xf]  ;;  %v4356_v33 = vld [vmem:[#allocation8 + $0x294] sm:$0xf0]  ;;  %v3054_v36 = vor.u32 %v4292_v28, %v3053_v27  ;;  %v3182_v37 = vor.u32 %v4324_v31, %v3181_v29 }
  0x96   :  { %1915 = vmatpush.bf16.msrb.mxu3 %v3898_v41  ;;  %v3437_v34 = vld [vmem:[#allocation8 + $0x388] sm:$0xf]  ;;  %v4388_v35 = vld [vmem:[#allocation8 + $0x394] sm:$0xf0]  ;;  %v3310_v38 = vor.u32 %v4356_v33, %v3309_v32 }
  0x97   :  { %1874 = vmatpush.bf16.msrb.mxu0 %v3498_v51  ;;  %v3037_v40 = vld [vmem:[#allocation8 + $0x68] sm:$0xf]  ;;  %v4288_v41 = vld [vmem:[#allocation8 + $0x74] sm:$0xf0]  ;;  %v3438_v45 = vor.u32 %v4388_v35, %v3437_v34 }
  0x98   :  { %1888 = vmatpush.bf16.msrb.mxu1 %v3626_v55  ;;  %v3165_v42 = vld [vmem:[#allocation8 + $0x168] sm:$0xf]  ;;  %v4320_v46 = vld [vmem:[#allocation8 + $0x174] sm:$0xf0]  ;;  %v3038_v52 = vor.u32 %v4288_v41, %v3037_v40 }
  0x99   :  { %1902 = vmatpush.bf16.msrb.mxu2 %v3754_v56  ;;  %v3293_v48 = vld [vmem:[#allocation8 + $0x268] sm:$0xf]  ;;  %v4352_v49 = vld [vmem:[#allocation8 + $0x274] sm:$0xf0]  ;;  %v3166_v53 = vor.u32 %v4320_v46, %v3165_v42 }
  0x9a   :  { %1916 = vmatpush.bf16.msrb.mxu3 %v3882_v60  ;;  %1875 = vmatmul.bf16.vlgmr.msrb.gmra.mxu0 %v4884_v39  ;;  %v3421_v50 = vld [vmem:[#allocation8 + $0x368] sm:$0xf]  ;;  %v4384_v51 = vld [vmem:[#allocation8 + $0x374] sm:$0xf0]  ;;  %v3294_v54 = vor.u32 %v4352_v49, %v3293_v48 }
  0x9b   :  { %1923 = vmatpush.bf16.msra.mxu0 %v3102_v61  ;;  %1889 = vmatmul.bf16.vlgmr.msrb.gmra.mxu1 %v4888_v44  ;;  %v3021_v55 = vld [vmem:[#allocation8 + $0x48] sm:$0xf]  ;;  %v4284_v56 = vld [vmem:[#allocation8 + $0x54] sm:$0xf0]  ;;  %v3422_v59 = vor.u32 %v4384_v51, %v3421_v50 }
  0x9c   :  { %1937 = vmatpush.bf16.msra.mxu1 %v3230_v62  ;;  %1903 = vmatmul.bf16.vlgmr.msrb.gmra.mxu2 %v4886_v43  ;;  %v3149_v57 = vld [vmem:[#allocation8 + $0x148] sm:$0xf]  ;;  %v4316_v60 = vld [vmem:[#allocation8 + $0x154] sm:$0xf0]  ;;  %v3022_v2 = vor.u32 %v4284_v56, %v3021_v55 }
  0x9d   :  { %1951 = vmatpush.bf16.msra.mxu2 %v3358_v63  ;;  %1917 = vmatmul.bf16.vlgmr.msrb.gmra.mxu3 %v4890_v47  ;;  %v3277_v61 = vld [vmem:[#allocation8 + $0x248] sm:$0xf]  ;;  %v4348_v62 = vld [vmem:[#allocation8 + $0x254] sm:$0xf0]  ;;  %v3150_v3 = vor.u32 %v4316_v60, %v3149_v57 }
  0x9e   :  { %1965 = vmatpush.bf16.msra.mxu3 %v3486_v4  ;;  %v3405_v63 = vld [vmem:[#allocation8 + $0x348] sm:$0xf]  ;;  %v4380_v0 = vld [vmem:[#allocation8 + $0x354] sm:$0xf0]  ;;  %v3278_v4 = vor.u32 %v4348_v62, %v3277_v61 }
  0x9f   :  { %1924 = vmatpush.bf16.msra.mxu0 %v3086_v11  ;;  %v3005_v5 = vld [vmem:[#allocation8 + $0x28] sm:$0xf]  ;;  %v4280_v6 = vld [vmem:[#allocation8 + $0x34] sm:$0xf0]  ;;  %v3406_v8 = vor.u32 %v4380_v0, %v3405_v63 }
  0xa0   :  { %1938 = vmatpush.bf16.msra.mxu1 %v3214_v12  ;;  %v3133_v7 = vld [vmem:[#allocation8 + $0x128] sm:$0xf]  ;;  %v4312_v9 = vld [vmem:[#allocation8 + $0x134] sm:$0xf0]  ;;  %v3006_v15 = vor.u32 %v4280_v6, %v3005_v5 }
  0xa1   :  { %1952 = vmatpush.bf16.msra.mxu2 %v3342_v13  ;;  %v3261_v11 = vld [vmem:[#allocation8 + $0x228] sm:$0xf]  ;;  %v4344_v12 = vld [vmem:[#allocation8 + $0x234] sm:$0xf0]  ;;  %v3134_v19 = vor.u32 %v4312_v9, %v3133_v7 }
  0xa2   :  { %1966 = vmatpush.bf16.msra.mxu3 %v3470_v18  ;;  %v3389_v13 = vld [vmem:[#allocation8 + $0x328] sm:$0xf]  ;;  %v4376_v14 = vld [vmem:[#allocation8 + $0x334] sm:$0xf0]  ;;  %v3262_v20 = vor.u32 %v4344_v12, %v3261_v11 }
  0xa3   :  { %1925 = vmatpush.bf16.msra.mxu0 %v3070_v24  ;;  %v2989_v16 = vld [vmem:[#allocation8 + $0x8] sm:$0xf]  ;;  %v4276_v18 = vld [vmem:[#allocation8 + $0x14] sm:$0xf0]  ;;  %v3390_v24 = vor.u32 %v4376_v14, %v3389_v13 }
  0xa4   :  { %1939 = vmatpush.bf16.msra.mxu1 %v3198_v25  ;;  %v3117_v21 = vld [vmem:[#allocation8 + $0x108] sm:$0xf]  ;;  %v4308_v22 = vld [vmem:[#allocation8 + $0x114] sm:$0xf0]  ;;  %v2990_v31 = vor.u32 %v4276_v18, %v2989_v16 }
  0xa5   :  { %1953 = vmatpush.bf16.msra.mxu2 %v3326_v26  ;;  %v3245_v23 = vld [vmem:[#allocation8 + $0x208] sm:$0xf]  ;;  %v4340_v25 = vld [vmem:[#allocation8 + $0x214] sm:$0xf0]  ;;  %v3118_v35 = vor.u32 %v4308_v22, %v3117_v21 }
  0xa6   :  { %1967 = vmatpush.bf16.msra.mxu3 %v3454_v30  ;;  %v3373_v26 = vld [vmem:[#allocation8 + $0x308] sm:$0xf]  ;;  %v4372_v27 = vld [vmem:[#allocation8 + $0x314] sm:$0xf0] }
  0xa7   :  { %1926 = vmatpush.bf16.msra.mxu0 %v3054_v36  ;;  %v3613_v28 = vld [vmem:[#allocation8 + $0x4e8] sm:$0xf]  ;;  %v4432_v29 = vld [vmem:[#allocation8 + $0x4f4] sm:$0xf0]  ;;  %v3246_v36 = vor.u32 %v4340_v25, %v3245_v23  ;;  %v3374_v40 = vor.u32 %v4372_v27, %v3373_v26 }
  0xa8   :  { %1940 = vmatpush.bf16.msra.mxu1 %v3182_v37  ;;  %v3741_v30 = vld [vmem:[#allocation8 + $0x5e8] sm:$0xf]  ;;  %v4464_v32 = vld [vmem:[#allocation8 + $0x5f4] sm:$0xf0]  ;;  %v3614_v41 = vor.u32 %v4432_v29, %v3613_v28 }
  0xa9   :  { %1954 = vmatpush.bf16.msra.mxu2 %v3310_v38  ;;  %v3869_v33 = vld [vmem:[#allocation8 + $0x6e8] sm:$0xf]  ;;  %v4496_v34 = vld [vmem:[#allocation8 + $0x6f4] sm:$0xf0]  ;;  %v3742_v42 = vor.u32 %v4464_v32, %v3741_v30 }
  0xaa   :  { %1968 = vmatpush.bf16.msra.mxu3 %v3438_v45  ;;  %v3997_v37 = vld [vmem:[#allocation8 + $0x7e8] sm:$0xf]  ;;  %v4528_v38 = vld [vmem:[#allocation8 + $0x7f4] sm:$0xf0]  ;;  %v3870_v45 = vor.u32 %v4496_v34, %v3869_v33 }
  0xab   :  { %1927 = vmatpush.bf16.msra.mxu0 %v3038_v52  ;;  %v3597_v46 = vld [vmem:[#allocation8 + $0x4c8] sm:$0xf]  ;;  %v4428_v48 = vld [vmem:[#allocation8 + $0x4d4] sm:$0xf0]  ;;  %v3998_v50 = vor.u32 %v4528_v38, %v3997_v37 }
  0xac   :  { %1941 = vmatpush.bf16.msra.mxu1 %v3166_v53  ;;  %v3725_v49 = vld [vmem:[#allocation8 + $0x5c8] sm:$0xf]  ;;  %v4460_v51 = vld [vmem:[#allocation8 + $0x5d4] sm:$0xf0]  ;;  %v3598_v56 = vor.u32 %v4428_v48, %v3597_v46 }
  0xad   :  { %1955 = vmatpush.bf16.msra.mxu2 %v3294_v54  ;;  %v3853_v52 = vld [vmem:[#allocation8 + $0x6c8] sm:$0xf]  ;;  %v4492_v53 = vld [vmem:[#allocation8 + $0x6d4] sm:$0xf0]  ;;  %v3726_v57 = vor.u32 %v4460_v51, %v3725_v49 }
  0xae   :  { %1969 = vmatpush.bf16.msra.mxu3 %v3422_v59  ;;  %v3981_v54 = vld [vmem:[#allocation8 + $0x7c8] sm:$0xf]  ;;  %v4524_v55 = vld [vmem:[#allocation8 + $0x7d4] sm:$0xf0]  ;;  %v3854_v59 = vor.u32 %v4492_v53, %v3853_v52 }
  0xaf   :  { %1928 = vmatpush.bf16.msra.mxu0 %v3022_v2  ;;  %v3581_v60 = vld [vmem:[#allocation8 + $0x4a8] sm:$0xf]  ;;  %v4424_v61 = vld [vmem:[#allocation8 + $0x4b4] sm:$0xf0]  ;;  %v3982_v63 = vor.u32 %v4524_v55, %v3981_v54 }
  0xb0   :  { %1942 = vmatpush.bf16.msra.mxu1 %v3150_v3  ;;  %v3709_v62 = vld [vmem:[#allocation8 + $0x5a8] sm:$0xf]  ;;  %v4456_v0 = vld [vmem:[#allocation8 + $0x5b4] sm:$0xf0]  ;;  %v3582_v6 = vor.u32 %v4424_v61, %v3581_v60 }
  0xb1   :  { %1956 = vmatpush.bf16.msra.mxu2 %v3278_v4  ;;  %v3837_v2 = vld [vmem:[#allocation8 + $0x6a8] sm:$0xf]  ;;  %v4488_v3 = vld [vmem:[#allocation8 + $0x6b4] sm:$0xf0]  ;;  %v3710_v7 = vor.u32 %v4456_v0, %v3709_v62 }
  0xb2   :  { %1970 = vmatpush.bf16.msra.mxu3 %v3406_v8  ;;  %v3965_v4 = vld [vmem:[#allocation8 + $0x7a8] sm:$0xf]  ;;  %v4520_v5 = vld [vmem:[#allocation8 + $0x7b4] sm:$0xf0]  ;;  %v3838_v8 = vor.u32 %v4488_v3, %v3837_v2 }
  0xb3   :  { %1929 = vmatpush.bf16.msra.mxu0 %v3006_v15  ;;  %v3565_v9 = vld [vmem:[#allocation8 + $0x488] sm:$0xf]  ;;  %v4420_v11 = vld [vmem:[#allocation8 + $0x494] sm:$0xf0]  ;;  %v3966_v13 = vor.u32 %v4520_v5, %v3965_v4 }
  0xb4   :  { %1943 = vmatpush.bf16.msra.mxu1 %v3134_v19  ;;  %v3693_v12 = vld [vmem:[#allocation8 + $0x588] sm:$0xf]  ;;  %v4452_v14 = vld [vmem:[#allocation8 + $0x594] sm:$0xf0] }
  0xb5   :  { %1957 = vmatpush.bf16.msra.mxu2 %v3262_v20  ;;  %v3821_v15 = vld [vmem:[#allocation8 + $0x688] sm:$0xf]  ;;  %v4484_v16 = vld [vmem:[#allocation8 + $0x694] sm:$0xf0]  ;;  %v3566_v20 = vor.u32 %v4420_v11, %v3565_v9  ;;  %v3694_v21 = vor.u32 %v4452_v14, %v3693_v12  ;;  %v4302_v11 = vld [vmem:[#allocation8 + $0xec] sm:$0xf] }
  0xb6   :  { %1971 = vmatpush.bf16.msra.mxu3 %v3390_v24  ;;  %v3949_v18 = vld [vmem:[#allocation8 + $0x788] sm:$0xf]  ;;  %v4516_v19 = vld [vmem:[#allocation8 + $0x794] sm:$0xf0]  ;;  %v3822_v22 = vor.u32 %v4484_v16, %v3821_v15  ;;  %v3103_v12 = vld [vmem:[#allocation8 + $0xf8] sm:$0xf0] }
  0xb7   :  { %1930 = vmatpush.bf16.msra.mxu0 %v2990_v31  ;;  %v3549_v23 = vld [vmem:[#allocation8 + $0x468] sm:$0xf]  ;;  %v4416_v24 = vld [vmem:[#allocation8 + $0x474] sm:$0xf0]  ;;  %v3950_v26 = vor.u32 %v4516_v19, %v3949_v18  ;;  %v3231_v15 = vld [vmem:[#allocation8 + $0x1f8] sm:$0xf0] }
  0xb8   :  { %1944 = vmatpush.bf16.msra.mxu1 %v3118_v35  ;;  %v3677_v25 = vld [vmem:[#allocation8 + $0x568] sm:$0xf]  ;;  %v4448_v27 = vld [vmem:[#allocation8 + $0x574] sm:$0xf0]  ;;  %v3550_v32 = vor.u32 %v4416_v24, %v3549_v23  ;;  %v4366_v16 = vld [vmem:[#allocation8 + $0x2ec] sm:$0xf]  ;;  %v3106_v24 = vor.u32 %v4302_v11, %v3103_v12 }
  0xb9   :  { %1958 = vmatpush.bf16.msra.mxu2 %v3246_v36  ;;  %v3805_v28 = vld [vmem:[#allocation8 + $0x668] sm:$0xf]  ;;  %v4480_v29 = vld [vmem:[#allocation8 + $0x674] sm:$0xf0]  ;;  %v3678_v33 = vor.u32 %v4448_v27, %v3677_v25  ;;  %v3359_v18 = vld [vmem:[#allocation8 + $0x2f8] sm:$0xf0] }
  0xba   :  { %1972 = vmatpush.bf16.msra.mxu3 %v3374_v40  ;;  %1931 = vmatmul.bf16.vlgmr.msra.gmra.mxu0 %v4872_v58  ;;  %v3933_v30 = vld [vmem:[#allocation8 + $0x768] sm:$0xf]  ;;  %v4512_v31 = vld [vmem:[#allocation8 + $0x774] sm:$0xf0]  ;;  %v3806_v34 = vor.u32 %v4480_v29, %v3805_v28  ;;  %v4298_v27 = vld [vmem:[#allocation8 + $0xcc] sm:$0xf] }
  0xbb   :  { %1979 = vmatpush.bf16.msrb.mxu0 %v3614_v41  ;;  %1945 = vmatmul.bf16.vlgmr.msra.gmra.mxu1 %v4878_v10  ;;  %v3533_v35 = vld [vmem:[#allocation8 + $0x448] sm:$0xf]  ;;  %v4412_v36 = vld [vmem:[#allocation8 + $0x454] sm:$0xf0]  ;;  %v3934_v38 = vor.u32 %v4512_v31, %v3933_v30  ;;  %v3087_v28 = vld [vmem:[#allocation8 + $0xd8] sm:$0xf0] }
  0xbc   :  { %1993 = vmatpush.bf16.msrb.mxu1 %v3742_v42  ;;  %1959 = vmatmul.bf16.vlgmr.msra.gmra.mxu2 %v4874_v1  ;;  %v3661_v37 = vld [vmem:[#allocation8 + $0x548] sm:$0xf]  ;;  %v4444_v40 = vld [vmem:[#allocation8 + $0x554] sm:$0xf0]  ;;  %v3534_v48 = vor.u32 %v4412_v36, %v3533_v35  ;;  %v4330_v29 = vld [vmem:[#allocation8 + $0x1cc] sm:$0xf]  ;;  %v3090_v36 = vor.u32 %v4298_v27, %v3087_v28 }
  0xbd   :  { %2007 = vmatpush.bf16.msrb.mxu2 %v3870_v45  ;;  %1973 = vmatmul.bf16.vlgmr.msra.gmra.mxu3 %v4880_v17  ;;  %v3789_v41 = vld [vmem:[#allocation8 + $0x648] sm:$0xf]  ;;  %v4476_v42 = vld [vmem:[#allocation8 + $0x654] sm:$0xf0]  ;;  %v3662_v49 = vor.u32 %v4444_v40, %v3661_v37  ;;  %v3215_v31 = vld [vmem:[#allocation8 + $0x1d8] sm:$0xf0] }
  0xbe   :  { %2021 = vmatpush.bf16.msrb.mxu3 %v3998_v50  ;;  %v3917_v45 = vld [vmem:[#allocation8 + $0x748] sm:$0xf]  ;;  %v4508_v46 = vld [vmem:[#allocation8 + $0x754] sm:$0xf0]  ;;  %v3790_v50 = vor.u32 %v4476_v42, %v3789_v41  ;;  %v3471_v35 = vld [vmem:[#allocation8 + $0x3d8] sm:$0xf0]  ;;  %v3218_v37 = vor.u32 %v4330_v29, %v3215_v31 }
  0xbf   :  { %1980 = vmatpush.bf16.msrb.mxu0 %v3598_v56  ;;  %v3517_v51 = vld [vmem:[#allocation8 + $0x428] sm:$0xf]  ;;  %v4408_v52 = vld [vmem:[#allocation8 + $0x434] sm:$0xf0]  ;;  %v3918_v54 = vor.u32 %v4508_v46, %v3917_v45  ;;  %v4294_v40 = vld [vmem:[#allocation8 + $0xac] sm:$0xf] }
  0xc0   :  { %1994 = vmatpush.bf16.msrb.mxu1 %v3726_v57  ;;  %v3645_v53 = vld [vmem:[#allocation8 + $0x528] sm:$0xf]  ;;  %v4440_v55 = vld [vmem:[#allocation8 + $0x534] sm:$0xf0]  ;;  %v3518_v61 = vor.u32 %v4408_v52, %v3517_v51  ;;  %v3071_v41 = vld [vmem:[#allocation8 + $0xb8] sm:$0xf0] }
  0xc1   :  { %2008 = vmatpush.bf16.msrb.mxu2 %v3854_v59  ;;  %v3773_v56 = vld [vmem:[#allocation8 + $0x628] sm:$0xf]  ;;  %v4472_v57 = vld [vmem:[#allocation8 + $0x634] sm:$0xf0]  ;;  %v3646_v0 = vor.u32 %v4440_v55, %v3645_v53  ;;  %v4326_v42 = vld [vmem:[#allocation8 + $0x1ac] sm:$0xf]  ;;  %v3074_v52 = vor.u32 %v4294_v40, %v3071_v41 }
  0xc2   :  { %2022 = vmatpush.bf16.msrb.mxu3 %v3982_v63  ;;  %v3901_v59 = vld [vmem:[#allocation8 + $0x728] sm:$0xf]  ;;  %v4504_v60 = vld [vmem:[#allocation8 + $0x734] sm:$0xf0]  ;;  %v3774_v2 = vor.u32 %v4472_v57, %v3773_v56  ;;  %v3199_v46 = vld [vmem:[#allocation8 + $0x1b8] sm:$0xf0] }
  0xc3   :  { %1981 = vmatpush.bf16.msrb.mxu0 %v3582_v6  ;;  %v3501_v62 = vld [vmem:[#allocation8 + $0x408] sm:$0xf]  ;;  %v4404_v63 = vld [vmem:[#allocation8 + $0x414] sm:$0xf0]  ;;  %v3902_v6 = vor.u32 %v4504_v60, %v3901_v59  ;;  %v3455_v51 = vld [vmem:[#allocation8 + $0x3b8] sm:$0xf0]  ;;  %v3202_v53 = vor.u32 %v4326_v42, %v3199_v46 }
  0xc4   :  { %1995 = vmatpush.bf16.msrb.mxu1 %v3710_v7  ;;  %v3629_v3 = vld [vmem:[#allocation8 + $0x508] sm:$0xf]  ;;  %v4436_v4 = vld [vmem:[#allocation8 + $0x514] sm:$0xf0]  ;;  %v3502_v14 = vor.u32 %v4404_v63, %v3501_v62  ;;  %v4290_v55 = vld [vmem:[#allocation8 + $0x8c] sm:$0xf] }
  0xc5   :  { %2009 = vmatpush.bf16.msrb.mxu2 %v3838_v8  ;;  %v3757_v5 = vld [vmem:[#allocation8 + $0x608] sm:$0xf]  ;;  %v4468_v7 = vld [vmem:[#allocation8 + $0x614] sm:$0xf0]  ;;  %v3630_v19 = vor.u32 %v4436_v4, %v3629_v3  ;;  %v3055_v56 = vld [vmem:[#allocation8 + $0x98] sm:$0xf0]  ;;  %v4912_v3 = vpop.f32.mrf.mxu0 }
  0xc6   :  { %2023 = vmatpush.bf16.msrb.mxu3 %v3966_v13  ;;  %v3885_v8 = vld [vmem:[#allocation8 + $0x708] sm:$0xf]  ;;  %v4500_v9 = vld [vmem:[#allocation8 + $0x714] sm:$0xf0]  ;;  %v4334_v13 = vld [vmem:[#allocation8 + $0x1ec] sm:$0xf] }
  0xc7   :  { %1982 = vmatpush.bf16.msrb.mxu0 %v3566_v20  ;;  %v3758_v20 = vor.u32 %v4468_v7, %v3757_v5  ;;  %v3886_v23 = vor.u32 %v4500_v9, %v3885_v8  ;;  %v3234_v25 = vor.u32 %v4334_v13, %v3231_v15  ;;  %v4322_v57 = vld [vmem:[#allocation8 + $0x18c] sm:$0xf]  ;;  %v3183_v60 = vld [vmem:[#allocation8 + $0x198] sm:$0xf0]  ;;  %v4914_v9 = vpop.f32.mrf.mxu1 }
  0xc8   :  { %1996 = vmatpush.bf16.msrb.mxu1 %v3694_v21  ;;  %v4398_v21 = vld [vmem:[#allocation8 + $0x3ec] sm:$0xf]  ;;  %v3311_v62 = vld [vmem:[#allocation8 + $0x298] sm:$0xf0]  ;;  %v3186_v4 = vor.u32 %v4322_v57, %v3183_v60 }
  0xc9   :  { %2010 = vmatpush.bf16.msrb.mxu2 %v3822_v22  ;;  %v3487_v22 = vld [vmem:[#allocation8 + $0x3f8] sm:$0xf0]  ;;  %v4386_v63 = vld [vmem:[#allocation8 + $0x38c] sm:$0xf] }
  0xca   :  { %2024 = vmatpush.bf16.msrb.mxu3 %v3950_v26  ;;  %v3362_v26 = vor.u32 %v4366_v16, %v3359_v18  ;;  %v3490_v30 = vor.u32 %v4398_v21, %v3487_v22  ;;  %v3039_v7 = vld [vmem:[#allocation8 + $0x78] sm:$0xf0]  ;;  %v4318_v8 = vld [vmem:[#allocation8 + $0x16c] sm:$0xf] }
  0xcb   :  { %1983 = vmatpush.bf16.msrb.mxu0 %v3550_v32  ;;  %v4362_v32 = vld [vmem:[#allocation8 + $0x2cc] sm:$0xf]  ;;  %v3167_v12 = vld [vmem:[#allocation8 + $0x178] sm:$0xf0] }
  0xcc   :  { %1997 = vmatpush.bf16.msrb.mxu1 %v3678_v33  ;;  %v3343_v33 = vld [vmem:[#allocation8 + $0x2d8] sm:$0xf0]  ;;  %v4350_v13 = vld [vmem:[#allocation8 + $0x26c] sm:$0xf] }
  0xcd   :  { %2011 = vmatpush.bf16.msrb.mxu2 %v3806_v34  ;;  %v4394_v34 = vld [vmem:[#allocation8 + $0x3cc] sm:$0xf]  ;;  %v3423_v16 = vld [vmem:[#allocation8 + $0x378] sm:$0xf0] }
  0xce   :  { %2025 = vmatpush.bf16.msrb.mxu3 %v3934_v38  ;;  %v3346_v38 = vor.u32 %v4362_v32, %v3343_v33  ;;  %v3474_v45 = vor.u32 %v4394_v34, %v3471_v35  ;;  %v4382_v15 = vld [vmem:[#allocation8 + $0x36c] sm:$0xf]  ;;  %v3023_v22 = vld [vmem:[#allocation8 + $0x58] sm:$0xf0]  ;;  %v4918_v32 = vpop.f32.mrf.mxu3 }
  0xcf   :  { %1984 = vmatpush.bf16.msrb.mxu0 %v3534_v48  ;;  %v4358_v48 = vld [vmem:[#allocation8 + $0x2ac] sm:$0xf]  ;;  %v3279_v27 = vld [vmem:[#allocation8 + $0x258] sm:$0xf0] }
  0xd0   :  { %1998 = vmatpush.bf16.msrb.mxu1 %v3662_v49  ;;  %v3327_v49 = vld [vmem:[#allocation8 + $0x2b8] sm:$0xf0]  ;;  %v4282_v21 = vld [vmem:[#allocation8 + $0x4c] sm:$0xf] }
  0xd1   :  { %2012 = vmatpush.bf16.msrb.mxu2 %v3790_v50  ;;  %v4390_v50 = vld [vmem:[#allocation8 + $0x3ac] sm:$0xf]  ;;  %v3407_v29 = vld [vmem:[#allocation8 + $0x358] sm:$0xf0]  ;;  %v3026_v31 = vor.u32 %v4282_v21, %v3023_v22 }
  0xd2   :  { %2026 = vmatpush.bf16.msrb.mxu3 %v3918_v54  ;;  %v3330_v54 = vor.u32 %v4358_v48, %v3327_v49  ;;  %v3458_v59 = vor.u32 %v4390_v50, %v3455_v51  ;;  %v4378_v28 = vld [vmem:[#allocation8 + $0x34c] sm:$0xf]  ;;  %v3135_v40 = vld [vmem:[#allocation8 + $0x138] sm:$0xf0]  ;;  %v4922_v49 = vpop.f32.mrf.mxu1 }
  0xd3   :  { %1985 = vmatpush.bf16.msrb.mxu0 %v3518_v61  ;;  %v4354_v61 = vld [vmem:[#allocation8 + $0x28c] sm:$0xf]  ;;  %v3263_v42 = vld [vmem:[#allocation8 + $0x238] sm:$0xf0] }
  0xd4   :  { %1999 = vmatpush.bf16.msrb.mxu1 %v3646_v0  ;;  %v3439_v0 = vld [vmem:[#allocation8 + $0x398] sm:$0xf0]  ;;  %v3314_v5 = vor.u32 %v4354_v61, %v3311_v62  ;;  %v4278_v35 = vld [vmem:[#allocation8 + $0x2c] sm:$0xf] }
  0xd5   :  { %2013 = vmatpush.bf16.msrb.mxu2 %v3774_v2  ;;  %v3058_v2 = vor.u32 %v4290_v55, %v3055_v56  ;;  %v3442_v11 = vor.u32 %v4386_v63, %v3439_v0  ;;  %v4342_v41 = vld [vmem:[#allocation8 + $0x22c] sm:$0xf]  ;;  %v3391_v48 = vld [vmem:[#allocation8 + $0x338] sm:$0xf0] }
  0xd6   :  { %2027 = vmatpush.bf16.msrb.mxu3 %v3902_v6  ;;  %v4286_v6 = vld [vmem:[#allocation8 + $0x6c] sm:$0xf]  ;;  %v3119_v56 = vld [vmem:[#allocation8 + $0x118] sm:$0xf0] }
  0xd7   :  { %1986 = vmatpush.bf16.msrb.mxu0 %v3502_v14  ;;  %v3295_v14 = vld [vmem:[#allocation8 + $0x278] sm:$0xf0]  ;;  %v3042_v18 = vor.u32 %v4286_v6, %v3039_v7  ;;  %v4374_v46 = vld [vmem:[#allocation8 + $0x32c] sm:$0xf] }
  0xd8   :  { %2000 = vmatpush.bf16.msrb.mxu1 %v3630_v19  ;;  %v3170_v19 = vor.u32 %v4318_v8, %v3167_v12  ;;  %v4274_v51 = vld [vmem:[#allocation8 + $0xc] sm:$0xf]  ;;  %v3247_v60 = vld [vmem:[#allocation8 + $0x218] sm:$0xf0] }
  0xd9   :  { %2014 = vmatpush.bf16.msrb.mxu2 %v3758_v20  ;;  %v3298_v20 = vor.u32 %v4350_v13, %v3295_v14  ;;  %v4306_v55 = vld [vmem:[#allocation8 + $0x10c] sm:$0xf]  ;;  %v3375_v62 = vld [vmem:[#allocation8 + $0x318] sm:$0xf0] }
  0xda   :  { %2028 = vmatpush.bf16.msrb.mxu3 %v3886_v23  ;;  %1987 = vmatmul.bf16.vlgmr.msrb.gmra.mxu0 %v4884_v39  ;;  %v4314_v23 = vld [vmem:[#allocation8 + $0x14c] sm:$0xf]  ;;  %v3615_v0 = vld [vmem:[#allocation8 + $0x4f8] sm:$0xf0]  ;;  %v3122_v8 = vor.u32 %v4306_v55, %v3119_v56 }
  0xdb   :  { %2035 = vmatpush.bf16.msra.mxu0 %v3106_v24  ;;  %2001 = vmatmul.bf16.vlgmr.msrb.gmra.mxu1 %v4888_v44  ;;  %v3426_v24 = vor.u32 %v4382_v15, %v3423_v16  ;;  %v4338_v57 = vld [vmem:[#allocation8 + $0x20c] sm:$0xf]  ;;  %v3871_v7 = vld [vmem:[#allocation8 + $0x6f8] sm:$0xf0] }
  0xdc   :  { %2049 = vmatpush.bf16.msra.mxu1 %v3234_v25  ;;  %2015 = vmatmul.bf16.vlgmr.msrb.gmra.mxu2 %v4886_v43  ;;  %v3151_v25 = vld [vmem:[#allocation8 + $0x158] sm:$0xf0]  ;;  %v4370_v61 = vld [vmem:[#allocation8 + $0x30c] sm:$0xf] }
  0xdd   :  { %2063 = vmatpush.bf16.msra.mxu2 %v3362_v26  ;;  %2029 = vmatmul.bf16.vlgmr.msrb.gmra.mxu3 %v4890_v47  ;;  %v4346_v26 = vld [vmem:[#allocation8 + $0x24c] sm:$0xf]  ;;  %v3154_v33 = vor.u32 %v4314_v23, %v3151_v25  ;;  %v3999_v13 = vld [vmem:[#allocation8 + $0x7f8] sm:$0xf0]  ;;  %v3378_v15 = vor.u32 %v4370_v61, %v3375_v62 }
  0xde   :  { %2077 = vmatpush.bf16.msra.mxu3 %v3490_v30  ;;  %v4916_v30 = vpop.f32.mrf.mxu2  ;;  %v3282_v34 = vor.u32 %v4346_v26, %v3279_v27  ;;  %v4430_v63 = vld [vmem:[#allocation8 + $0x4ec] sm:$0xf]  ;;  %v3599_v22 = vld [vmem:[#allocation8 + $0x4d8] sm:$0xf0] }
  0xdf   :  { %2036 = vmatpush.bf16.msra.mxu0 %v3090_v36  ;;  %v3007_v36 = vld [vmem:[#allocation8 + $0x38] sm:$0xf0]  ;;  %v4494_v6 = vld [vmem:[#allocation8 + $0x6ec] sm:$0xf]  ;;  %v3618_v16 = vor.u32 %v4430_v63, %v3615_v0 }
  0xe0   :  { %2050 = vmatpush.bf16.msra.mxu1 %v3218_v37  ;;  %v4310_v37 = vld [vmem:[#allocation8 + $0x12c] sm:$0xf]  ;;  %v3010_v50 = vor.u32 %v4278_v35, %v3007_v36  ;;  %v3727_v25 = vld [vmem:[#allocation8 + $0x5d8] sm:$0xf0] }
  0xe1   :  { %2064 = vmatpush.bf16.msra.mxu2 %v3346_v38  ;;  %v3410_v38 = vor.u32 %v4378_v28, %v3407_v29  ;;  %v4526_v12 = vld [vmem:[#allocation8 + $0x7ec] sm:$0xf]  ;;  %v3855_v27 = vld [vmem:[#allocation8 + $0x6d8] sm:$0xf0] }
  0xe2   :  { %2078 = vmatpush.bf16.msra.mxu3 %v3474_v45  ;;  %v4920_v45 = vpop.f32.mrf.mxu0  ;;  %v4426_v21 = vld [vmem:[#allocation8 + $0x4cc] sm:$0xf]  ;;  %v3567_v56 = vld [vmem:[#allocation8 + $0x498] sm:$0xf0] }
  0xe3   :  { %2037 = vmatpush.bf16.msra.mxu0 %v3074_v52  ;;  %v2991_v52 = vld [vmem:[#allocation8 + $0x18] sm:$0xf0]  ;;  %v4458_v23 = vld [vmem:[#allocation8 + $0x5cc] sm:$0xf] }
  0xe4   :  { %2051 = vmatpush.bf16.msra.mxu1 %v3202_v53  ;;  %v3138_v53 = vor.u32 %v4310_v37, %v3135_v40  ;;  %v4490_v26 = vld [vmem:[#allocation8 + $0x6cc] sm:$0xf]  ;;  %v3730_v35 = vor.u32 %v4458_v23, %v3727_v25  ;;  %v3951_v63 = vld [vmem:[#allocation8 + $0x798] sm:$0xf0] }
  0xe5   :  { %2065 = vmatpush.bf16.msra.mxu2 %v3330_v54  ;;  %v3266_v54 = vor.u32 %v4342_v41, %v3263_v42  ;;  %v4522_v29 = vld [vmem:[#allocation8 + $0x7cc] sm:$0xf]  ;;  %v3858_v36 = vor.u32 %v4490_v26, %v3855_v27  ;;  %v3711_v42 = vld [vmem:[#allocation8 + $0x5b8] sm:$0xf0] }
  0xe6   :  { %2079 = vmatpush.bf16.msra.mxu3 %v3458_v59  ;;  %v3394_v59 = vor.u32 %v4374_v46, %v3391_v48  ;;  %v4924_v14 = vpop.f32.mrf.mxu2  ;;  %v4422_v37 = vld [vmem:[#allocation8 + $0x4ac] sm:$0xf]  ;;  %v3839_v48 = vld [vmem:[#allocation8 + $0x6b8] sm:$0xf0] }
  0xe7   :  { %2038 = vmatpush.bf16.msra.mxu0 %v3058_v2  ;;  %v4462_v2 = vld [vmem:[#allocation8 + $0x5ec] sm:$0xf]  ;;  %v3663_v27 = vld [vmem:[#allocation8 + $0x558] sm:$0xf0] }
  0xe8   :  { %2052 = vmatpush.bf16.msra.mxu1 %v3186_v4  ;;  %v2994_v4 = vor.u32 %v4274_v51, %v2991_v52  ;;  %v4454_v40 = vld [vmem:[#allocation8 + $0x5ac] sm:$0xf]  ;;  %v3967_v51 = vld [vmem:[#allocation8 + $0x7b8] sm:$0xf0] }
  0xe9   :  { %2066 = vmatpush.bf16.msra.mxu2 %v3314_v5  ;;  %v3743_v5 = vld [vmem:[#allocation8 + $0x5f8] sm:$0xf0]  ;;  %v4486_v46 = vld [vmem:[#allocation8 + $0x6ac] sm:$0xf] }
  0xea   :  { %2080 = vmatpush.bf16.msra.mxu3 %v3442_v11  ;;  %v3250_v11 = vor.u32 %v4338_v57, %v3247_v60  ;;  %v4928_v28 = vpop.f32.mrf.mxu0  ;;  %v4418_v55 = vld [vmem:[#allocation8 + $0x48c] sm:$0xf]  ;;  %v3695_v60 = vld [vmem:[#allocation8 + $0x598] sm:$0xf0] }
  0xeb   :  { %2039 = vmatpush.bf16.msra.mxu0 %v3042_v18  ;;  %v4926_v18 = vpop.f32.mrf.mxu3  ;;  %v4482_v61 = vld [vmem:[#allocation8 + $0x68c] sm:$0xf] }
  0xec   :  { %2053 = vmatpush.bf16.msra.mxu1 %v3170_v19  ;;  %v3746_v19 = vor.u32 %v4462_v2, %v3743_v5  ;;  %v4414_v5 = vld [vmem:[#allocation8 + $0x46c] sm:$0xf] }
  0xed   :  { %2067 = vmatpush.bf16.msra.mxu2 %v3298_v20  ;;  %v3874_v20 = vor.u32 %v4494_v6, %v3871_v7  ;;  %v3551_v6 = vld [vmem:[#allocation8 + $0x478] sm:$0xf0]  ;;  %v4446_v7 = vld [vmem:[#allocation8 + $0x56c] sm:$0xf] }
  0xee   :  { %2081 = vmatpush.bf16.msra.mxu3 %v3426_v24  ;;  %v4002_v24 = vor.u32 %v4526_v12, %v3999_v13  ;;  %v4936_v57 = vpop.f32.mrf.mxu2  ;;  %v3679_v12 = vld [vmem:[#allocation8 + $0x578] sm:$0xf0]  ;;  %v4478_v13 = vld [vmem:[#allocation8 + $0x66c] sm:$0xf] }
  0xef   :  { %2040 = vmatpush.bf16.msra.mxu0 %v3026_v31  ;;  %v3983_v31 = vld [vmem:[#allocation8 + $0x7d8] sm:$0xf0]  ;;  %v4410_v23 = vld [vmem:[#allocation8 + $0x44c] sm:$0xf] }
  0xf0   :  { %2054 = vmatpush.bf16.msra.mxu1 %v3154_v33  ;;  %v4930_v33 = vpop.f32.mrf.mxu1  ;;  %v3986_v41 = vor.u32 %v4522_v29, %v3983_v31  ;;  %v4442_v25 = vld [vmem:[#allocation8 + $0x54c] sm:$0xf]  ;;  %v3791_v31 = vld [vmem:[#allocation8 + $0x658] sm:$0xf0] }
  0xf1   :  { %2068 = vmatpush.bf16.msra.mxu2 %v3282_v34  ;;  %v3602_v34 = vor.u32 %v4426_v21, %v3599_v22  ;;  %v3682_v21 = vor.u32 %v4446_v7, %v3679_v12  ;;  %v4474_v29 = vld [vmem:[#allocation8 + $0x64c] sm:$0xf] }
  0xf2   :  { %2082 = vmatpush.bf16.msra.mxu3 %v3410_v38  ;;  %v3583_v38 = vld [vmem:[#allocation8 + $0x4b8] sm:$0xf0]  ;;  %v4940_v0 = vpop.f32.mrf.mxu0  ;;  %v4466_v7 = vld [vmem:[#allocation8 + $0x60c] sm:$0xf] }
  0xf3   :  { %2041 = vmatpush.bf16.msra.mxu0 %v3010_v50  ;;  %v4518_v50 = vld [vmem:[#allocation8 + $0x7ac] sm:$0xf]  ;;  %v3586_v52 = vor.u32 %v4422_v37, %v3583_v38  ;;  %v4938_v62 = vpop.f32.mrf.mxu3 }
  0xf4   :  { %2055 = vmatpush.bf16.msra.mxu1 %v3138_v53  ;;  %v3714_v53 = vor.u32 %v4454_v40, %v3711_v42  ;;  %v3794_v42 = vor.u32 %v4474_v29, %v3791_v31  ;;  %v4498_v12 = vld [vmem:[#allocation8 + $0x70c] sm:$0xf] }
  0xf5   :  { %2069 = vmatpush.bf16.msra.mxu2 %v3266_v54  ;;  %v3842_v54 = vor.u32 %v4486_v46, %v3839_v48  ;;  %v4406_v48 = vld [vmem:[#allocation8 + $0x42c] sm:$0xf] }
  0xf6   :  { %2083 = vmatpush.bf16.msra.mxu3 %v3394_v59  ;;  %v3970_v59 = vor.u32 %v4518_v50, %v3967_v51  ;;  %v4946_v37 = vpop.f32.mrf.mxu2  ;;  %v3519_v50 = vld [vmem:[#allocation8 + $0x438] sm:$0xf0]  ;;  %v4438_v51 = vld [vmem:[#allocation8 + $0x52c] sm:$0xf] }
  0xf7   :  { %2042 = vmatpush.bf16.msra.mxu0 %v2994_v4 }
  0xf8   :  { %2056 = vmatpush.bf16.msra.mxu1 %v3122_v8  ;;  %v4942_v8 = vpop.f32.mrf.mxu1 }
  0xf9   :  { %2070 = vmatpush.bf16.msra.mxu2 %v3250_v11 }
  0xfa   :  { %2084 = vmatpush.bf16.msra.mxu3 %v3378_v15  ;;  %2043 = vmatmul.bf16.vlgmr.msra.gmra.mxu0 %v4872_v58  ;;  %v3823_v58 = vld [vmem:[#allocation8 + $0x698] sm:$0xf0]  ;;  %v1820_v46 = vpop.f32.mrf.mxu0 }
  0xfb   :  { %2091 = vmatpush.bf16.msrb.mxu0 %v3618_v16  ;;  %2057 = vmatmul.bf16.vlgmr.msra.gmra.mxu1 %v4878_v10  ;;  %v3570_v10 = vor.u32 %v4418_v55, %v3567_v56  ;;  %v3826_v4 = vor.u32 %v4482_v61, %v3823_v58  ;;  %v3807_v15 = vld [vmem:[#allocation8 + $0x678] sm:$0xf0]  ;;  %v4510_v16 = vld [vmem:[#allocation8 + $0x76c] sm:$0xf]  ;;  %v4948_v40 = vpop.f32.mrf.mxu3  ;;  %v3522_v58 = vor.u32 %v4406_v48, %v3519_v50  ;;  %v4117_v48 = vld [vmem:[#allocation11 + $0xe0] sm:$0xf] }
  0xfc   :  { %2105 = vmatpush.bf16.msrb.mxu1 %v3746_v19  ;;  %2071 = vmatmul.bf16.vlgmr.msra.gmra.mxu2 %v4874_v1  ;;  %v4450_v1 = vld [vmem:[#allocation8 + $0x58c] sm:$0xf]  ;;  %v3935_v19 = vld [vmem:[#allocation8 + $0x778] sm:$0xf0]  ;;  %v3810_v22 = vor.u32 %v4478_v13, %v3807_v15  ;;  %v4061_v15 = vld [vmem:[#allocation11 + $0x70] sm:$0xf] }
  0xfd   :  { %2119 = vmatpush.bf16.msrb.mxu2 %v3874_v20  ;;  %2085 = vmatmul.bf16.vlgmr.msra.gmra.mxu3 %v4880_v17  ;;  %v4514_v17 = vld [vmem:[#allocation8 + $0x78c] sm:$0xf]  ;;  %v3698_v2 = vor.u32 %v4450_v1, %v3695_v60  ;;  %v3554_v20 = vor.u32 %v4414_v5, %v3551_v6  ;;  %v3938_v26 = vor.u32 %v4510_v16, %v3935_v19  ;;  %v3775_v55 = vld [vmem:[#allocation8 + $0x638] sm:$0xf0] }
  0xfe   :  { %2133 = vmatpush.bf16.msrb.mxu3 %v4002_v24  ;;  %v3954_v11 = vor.u32 %v4514_v17, %v3951_v63  ;;  %v3535_v24 = vld [vmem:[#allocation8 + $0x458] sm:$0xf0]  ;;  %v4502_v1 = vld [vmem:[#allocation8 + $0x72c] sm:$0xf] }
  0xff   :  { %2092 = vmatpush.bf16.msrb.mxu0 %v3602_v34  ;;  %v4506_v34 = vld [vmem:[#allocation8 + $0x74c] sm:$0xf]  ;;  %v3538_v38 = vor.u32 %v4410_v23, %v3535_v24  ;;  %v3631_v5 = vld [vmem:[#allocation8 + $0x518] sm:$0xf0]  ;;  %v1848_v24 = vpop.f32.mrf.mxu2 }
 0x100   :  { %2106 = vmatpush.bf16.msrb.mxu1 %v3730_v35  ;;  %v3919_v35 = vld [vmem:[#allocation8 + $0x758] sm:$0xf0]  ;;  %v1834_v56 = vpop.f32.mrf.mxu1  ;;  %v4402_v17 = vld [vmem:[#allocation8 + $0x40c] sm:$0xf] }
 0x101   :  { %2120 = vmatpush.bf16.msrb.mxu2 %v3858_v36  ;;  %v4944_v36 = vld [vmem:[#allocation10] sm:$0xf]  ;;  %v3887_v13 = vld [vmem:[#allocation8 + $0x718] sm:$0xf0]  ;;  %v4558_v50 = vld [vmem:[#allocation11 + $0xe4] sm:$0xf0] }
 0x102   :  { %2134 = vmatpush.bf16.msrb.mxu3 %v3986_v41  ;;  %v3666_v41 = vor.u32 %v4442_v25, %v3663_v27  ;;  %v371_v60 = vperm.slane %v4944_v36, 0  ;;  %v372_v61 = vperm.slane %v4944_v36, 1  ;;  %v4544_v16 = vld [vmem:[#allocation11 + $0x74] sm:$0xf0]  ;;  %v3890_v31 = vor.u32 %v4498_v12, %v3887_v13  ;;  %v4554_v12 = vld [vmem:[#allocation11 + $0xc4] sm:$0xf0] }
 0x103   :  { %2093 = vmatpush.bf16.msrb.mxu0 %v3586_v52  ;;  %v3922_v52 = vor.u32 %v4506_v34, %v3919_v35  ;;  %v4560_v23 = vld [vmem:[#allocation11 + $0xf4] sm:$0xf0]  ;;  %v1862_v29 = vpop.f32.mrf.mxu3  ;;  %v4062_v34 = vor.u32 %v4544_v16, %v4061_v15 }
 0x104   :  { %2107 = vmatpush.bf16.msrb.mxu1 %v3714_v53  ;;  %v3647_v53 = vld [vmem:[#allocation8 + $0x538] sm:$0xf0]  ;;  %v1709_v19 = vadd.f32 %v4912_v3, %v371_v60  ;;  %v1821_v25 = vadd.f32 %v1820_v46, %v372_v61  ;;  %v4542_v3 = vld [vmem:[#allocation11 + $0x64] sm:$0xf0] }
 0x105   :  { %2121 = vmatpush.bf16.msrb.mxu2 %v3842_v54  ;;  %v4470_v54 = vld [vmem:[#allocation8 + $0x62c] sm:$0xf]  ;;  %v3650_v63 = vor.u32 %v4438_v51, %v3647_v53  ;;  %v4189_v53 = vld [vmem:[#allocation11 + $0x170] sm:$0xf] }
 0x106   :  { %2135 = vmatpush.bf16.msrb.mxu3 %v3970_v59  ;;  %v3903_v59 = vld [vmem:[#allocation8 + $0x738] sm:$0xf0]  ;;  %v1835_v51 = vadd.f32 %v1834_v56, %v1821_v25  ;;  %v4109_v56 = vld [vmem:[#allocation11 + $0xd0] sm:$0xf] }
 0x107   :  { %2094 = vmatpush.bf16.msrb.mxu0 %v3570_v10  ;;  %v3778_v10 = vor.u32 %v4470_v54, %v3775_v55  ;;  %v3906_v6 = vor.u32 %v4502_v1, %v3903_v59  ;;  %v4576_v54 = vld [vmem:[#allocation11 + $0x174] sm:$0xf0]  ;;  %v4118_v1 = vor.u32 %v4558_v50, %v4117_v48 }
 0x108   :  { %2108 = vmatpush.bf16.msrb.mxu1 %v3698_v2  ;;  %v3503_v2 = vld [vmem:[#allocation8 + $0x418] sm:$0xf0]  ;;  %v1836_v46 = vpop.f32.mrf.mxu1 }
 0x109   :  { %2122 = vmatpush.bf16.msrb.mxu2 %v3826_v4  ;;  %v4434_v4 = vld [vmem:[#allocation8 + $0x50c] sm:$0xf]  ;;  %v4540_v59 = vld [vmem:[#allocation11 + $0x54] sm:$0xf0] }
 0x10a   :  { %2136 = vmatpush.bf16.msrb.mxu3 %v3954_v11  ;;  %v3759_v11 = vld [vmem:[#allocation8 + $0x618] sm:$0xf0] }
 0x10b   :  { %2095 = vmatpush.bf16.msrb.mxu0 %v3554_v20  ;;  %v1711_v20 = vadd.f32 %v4920_v45, %v371_v60  ;;  %v3762_v27 = vor.u32 %v4466_v7, %v3759_v11  ;;  %v1723_v45 = vadd.f32 %v4914_v9, %v1709_v19  ;;  %v4045_v9 = vld [vmem:[#allocation11 + $0x50] sm:$0xf]  ;;  %v4101_v11 = vld [vmem:[#allocation11 + $0xc0] sm:$0xf] }
 0x10c   :  { %2109 = vmatpush.bf16.msrb.mxu1 %v3682_v21  ;;  %v3506_v21 = vor.u32 %v4402_v17, %v3503_v2  ;;  %v4556_v17 = vld [vmem:[#allocation11 + $0xd4] sm:$0xf0]  ;;  %v4574_v2 = vld [vmem:[#allocation11 + $0x164] sm:$0xf0]  ;;  %v4173_v19 = vld [vmem:[#allocation11 + $0x150] sm:$0xf] }
 0x10d   :  { %2123 = vmatpush.bf16.msrb.mxu2 %v3810_v22  ;;  %v4125_v22 = vld [vmem:[#allocation11 + $0xf0] sm:$0xf]  ;;  %v1737_v60 = vadd.f32 %v4916_v30, %v1723_v45  ;;  %v4110_v30 = vor.u32 %v4556_v17, %v4109_v56  ;;  %v4534_v45 = vld [vmem:[#allocation11 + $0x24] sm:$0xf0] }
 0x10e   :  { %2137 = vmatpush.bf16.msrb.mxu3 %v3938_v26  ;;  %v3634_v26 = vor.u32 %v4434_v4, %v3631_v5  ;;  %v4126_v35 = vor.u32 %v4560_v23, %v4125_v22  ;;  %v1864_v5 = vpop.f32.mrf.mxu3  ;;  %v4102_v22 = vor.u32 %v4554_v12, %v4101_v11  ;;  %v4029_v23 = vld [vmem:[#allocation11 + $0x30] sm:$0xf]  ;;  %v4543_v11 = vld [vmem:[#allocation11 + $0x74] sm:$0xf]  ;;  %v4063_v12 = vld [vmem:[#allocation11 + $0x78] sm:$0xf0] }
 0x10f   :  { %2096 = vmatpush.bf16.msrb.mxu0 %v3538_v38  ;;  %v1822_v38 = vpop.f32.mrf.mxu0  ;;  %v4077_v17 = vld [vmem:[#allocation11 + $0x90] sm:$0xf] }
 0x110   :  { %2110 = vmatpush.bf16.msrb.mxu1 %v3666_v41  ;;  %v4053_v41 = vld [vmem:[#allocation11 + $0x60] sm:$0xf]  ;;  %v1823_v55 = vadd.f32 %v1822_v38, %v372_v61  ;;  %v1850_v61 = vpop.f32.mrf.mxu2 }
 0x111   :  { %2124 = vmatpush.bf16.msrb.mxu2 %v3794_v42  ;;  %v1725_v42 = vadd.f32 %v4922_v49, %v1711_v20  ;;  %v4190_v49 = vor.u32 %v4576_v54, %v4189_v53  ;;  %v4572_v20 = vld [vmem:[#allocation11 + $0x154] sm:$0xf0] }
 0x112   :  { %2138 = vmatpush.bf16.msrb.mxu3 %v3922_v52  ;;  %v4054_v52 = vor.u32 %v4542_v3, %v4053_v41  ;;  %v1837_v4 = vadd.f32 %v1836_v46, %v1823_v55  ;;  %v4174_v25 = vor.u32 %v4572_v20, %v4173_v19  ;;  %v4021_v3 = vld [vmem:[#allocation11 + $0x20] sm:$0xf]  ;;  %v4550_v46 = vld [vmem:[#allocation11 + $0xa4] sm:$0xf0] }
 0x113   :  { %2097 = vmatpush.bf16.msrb.mxu0 %v3522_v58  ;;  %v1739_v58 = vadd.f32 %v4924_v14, %v1725_v42  ;;  %v4037_v14 = vld [vmem:[#allocation11 + $0x40] sm:$0xf]  ;;  %v4022_v55 = vor.u32 %v4534_v45, %v4021_v3 }
 0x114   :  { %2111 = vmatpush.bf16.msrb.mxu1 %v3650_v63  ;;  %v1849_v63 = vadd.f32 %v1848_v24, %v1835_v51  ;;  %v4536_v24 = vld [vmem:[#allocation11 + $0x34] sm:$0xf0] }
 0x115   :  { %2125 = vmatpush.bf16.msrb.mxu2 %v3778_v10  ;;  %v4181_v10 = vld [vmem:[#allocation11 + $0x160] sm:$0xf]  ;;  %v1753_v7 = vadd.f32 %v4926_v18, %v1739_v58 }
 0x116   :  { %2139 = vmatpush.bf16.msrb.mxu3 %v3906_v6  ;;  %v4538_v6 = vld [vmem:[#allocation11 + $0x44] sm:$0xf0] }
 0x117   :  { %2098 = vmatpush.bf16.msrb.mxu0 %v3506_v21  ;;  %v1876_v13 = vpop.f32.mrf.mxu0  ;;  %v4038_v15 = vor.u32 %v4538_v6, %v4037_v14  ;;  %v1851_v21 = vadd.f32 %v1850_v61, %v1837_v4  ;;  %v1767_v18 = vadd.f32 %v4940_v0, %v1753_v7  ;;  %v4085_v0 = vld [vmem:[#allocation11 + $0xa0] sm:$0xf]  ;;  %v4530_v14 = vld [vmem:[#allocation11 + $0x4] sm:$0xf0] }
 0x118   :  { %2112 = vmatpush.bf16.msrb.mxu1 %v3634_v26  ;;  %v1890_v16 = vpop.f32.mrf.mxu1  ;;  %v4093_v26 = vld [vmem:[#allocation11 + $0xb0] sm:$0xf]  ;;  %v4069_v6 = vld [vmem:[#allocation11 + $0x80] sm:$0xf]  ;;  %v4546_v7 = vld [vmem:[#allocation11 + $0x84] sm:$0xf0] }
 0x119   :  { %2126 = vmatpush.bf16.msrb.mxu2 %v3762_v27  ;;  %v4552_v27 = vld [vmem:[#allocation11 + $0xb4] sm:$0xf0]  ;;  %v1865_v38 = vadd.f32 %v1864_v5, %v1851_v21  ;;  %v4005_v5 = vld [vmem:[#allocation11] sm:$0xf]  ;;  %v4141_v21 = vld [vmem:[#allocation11 + $0x110] sm:$0xf] }
 0x11a   :  { %2140 = vmatpush.bf16.msrb.mxu3 %v3890_v31  ;;  %2099 = vmatmul.bf16.vlgmr.msrb.gmra.mxu0 %v4884_v39  ;;  %v4046_v39 = vor.u32 %v4540_v59, %v4045_v9  ;;  %v4030_v31 = vor.u32 %v4536_v24, %v4029_v23  ;;  %v4094_v41 = vor.u32 %v4552_v27, %v4093_v26  ;;  %v4568_v9 = vld [vmem:[#allocation11 + $0x134] sm:$0xf0]  ;;  %v4541_v26 = vld [vmem:[#allocation11 + $0x64] sm:$0xf]  ;;  %v4055_v27 = vld [vmem:[#allocation11 + $0x68] sm:$0xf0] }
 0x11b   :  { %2543 = vmatpush.bf16.msra.mxu0 %v4062_v34  ;;  %2113 = vmatmul.bf16.vlgmr.msrb.gmra.mxu1 %v4888_v44  ;;  %v4182_v44 = vor.u32 %v4574_v2, %v4181_v10  ;;  %v4165_v34 = vld [vmem:[#allocation11 + $0x140] sm:$0xf]  ;;  %v4566_v2 = vld [vmem:[#allocation11 + $0x124] sm:$0xf0]  ;;  %v4006_v20 = vor.u32 %v4530_v14, %v4005_v5  ;;  %v4070_v23 = vor.u32 %v4546_v7, %v4069_v6  ;;  %v4533_v14 = vld [vmem:[#allocation11 + $0x24] sm:$0xf] }
 0x11c   :  { %2557 = vmatpush.bf16.msra.mxu1 %v4126_v35  ;;  %2127 = vmatmul.bf16.vlgmr.msrb.gmra.mxu2 %v4886_v43  ;;  %v1751_v43 = vadd.f32 %v4918_v32, %v1737_v60  ;;  %v4570_v35 = vld [vmem:[#allocation11 + $0x144] sm:$0xf0]  ;;  %v4013_v60 = vld [vmem:[#allocation11 + $0x10] sm:$0xf]  ;;  %v4149_v10 = vld [vmem:[#allocation11 + $0x120] sm:$0xf]  ;;  %v4066_v24 = vor.u32 %v4543_v11, %v4063_v12  ;;  %v4058_v45 = vor.u32 %v4541_v26, %v4055_v27 }
 0x11d   :  { %2141 = vmatmul.bf16.vlgmr.msrb.gmra.mxu3 %v4890_v47  ;;  %2571 = vmatpush.bf16.msra.mxu2 %v4190_v49  ;;  %v1863_v47 = vadd.f32 %v1862_v29, %v1849_v63  ;;  %v4166_v42 = vor.u32 %v4570_v35, %v4165_v34  ;;  %v4086_v49 = vor.u32 %v4550_v46, %v4085_v0  ;;  %v4548_v63 = vld [vmem:[#allocation11 + $0x94] sm:$0xf0]  ;;  %v4557_v34 = vld [vmem:[#allocation11 + $0xe4] sm:$0xf]  ;;  %v4119_v35 = vld [vmem:[#allocation11 + $0xe8] sm:$0xf0] }
 0x11e   :  { %v1765_v32 = vadd.f32 %v4928_v28, %v1751_v43  ;;  %v1781_v28 = vadd.f32 %v4942_v8, %v1767_v18  ;;  %v4575_v46 = vld [vmem:[#allocation11 + $0x174] sm:$0xf]  ;;  %v4167_v7 = vld [vmem:[#allocation11 + $0x148] sm:$0xf0]  ;;  %v4549_v11 = vld [vmem:[#allocation11 + $0xa4] sm:$0xf] }
 0x11f   :  { %2544 = vmatpush.bf16.msra.mxu0 %v4054_v52  ;;  %v1877_v29 = vadd.f32 %v1876_v13, %v1863_v47  ;;  %v1904_v50 = vpop.f32.mrf.mxu2  ;;  %v1878_v52 = vpop.f32.mrf.mxu0  ;;  %v4087_v12 = vld [vmem:[#allocation11 + $0xa8] sm:$0xf0] }
 0x120   :  { %2558 = vmatpush.bf16.msra.mxu1 %v4118_v1  ;;  %v1779_v48 = vadd.f32 %v4930_v33, %v1765_v32  ;;  %v1918_v53 = vpop.f32.mrf.mxu3  ;;  %v1795_v54 = vadd.f32 %v4946_v37, %v1781_v28  ;;  %v4157_v1 = vld [vmem:[#allocation11 + $0x130] sm:$0xf]  ;;  %v1879_v59 = vadd.f32 %v1878_v52, %v1865_v38  ;;  %v4532_v33 = vld [vmem:[#allocation11 + $0x14] sm:$0xf0]  ;;  %v1892_v56 = vpop.f32.mrf.mxu1  ;;  %v4539_v38 = vld [vmem:[#allocation11 + $0x54] sm:$0xf] }
 0x121   :  { %2572 = vmatpush.bf16.msra.mxu2 %v4182_v44  ;;  %v1891_v51 = vadd.f32 %v1890_v16, %v1877_v29  ;;  %v4158_v58 = vor.u32 %v4568_v9, %v4157_v1  ;;  %v4014_v37 = vor.u32 %v4532_v33, %v4013_v60  ;;  %v4150_v44 = vor.u32 %v4566_v2, %v4149_v10  ;;  %v4127_v16 = vld [vmem:[#allocation11 + $0xf8] sm:$0xf0]  ;;  %v4562_v28 = vld [vmem:[#allocation11 + $0x104] sm:$0xf0]  ;;  %v4573_v52 = vld [vmem:[#allocation11 + $0x164] sm:$0xf] }
 0x122   :  { %v1793_v8 = vadd.f32 %v4936_v57, %v1779_v48  ;;  %v4971_v61 = vadd.f32 %v4948_v40, %v1795_v54  ;;  %v1893_v4 = vadd.f32 %v1892_v56, %v1879_v59  ;;  %v4133_v48 = vld [vmem:[#allocation11 + $0x100] sm:$0xf]  ;;  %v4111_v54 = vld [vmem:[#allocation11 + $0xd8] sm:$0xf0]  ;;  %v4183_v1 = vld [vmem:[#allocation11 + $0x168] sm:$0xf0] }
 0x123   :  { %2545 = vmatpush.bf16.msra.mxu0 %v4046_v39  ;;  %v1905_v39 = vadd.f32 %v1904_v50, %v1891_v51  ;;  %v4122_v50 = vor.u32 %v4557_v34, %v4119_v35  ;;  %v4134_v0 = vor.u32 %v4562_v28, %v4133_v48  ;;  %v4191_v51 = vld [vmem:[#allocation11 + $0x178] sm:$0xf0]  ;;  %v4186_v59 = vor.u32 %v4573_v52, %v4183_v1  ;;  %v4537_v60 = vld [vmem:[#allocation11 + $0x44] sm:$0xf]  ;;  %v4039_v33 = vld [vmem:[#allocation11 + $0x48] sm:$0xf0] }
 0x124   :  { %2559 = vmatpush.bf16.msra.mxu1 %v4110_v30  ;;  %v4078_v30 = vor.u32 %v4548_v63, %v4077_v17  ;;  %v4974_v57 = vadd.f32 %v4938_v62, %v1793_v8  ;;  %v2151_v19 = vmax.f32 %v4971_v61, 0.0  ;;  %v4103_v8 = vld [vmem:[#allocation11 + $0xc8] sm:$0xf0]  ;;  %v4042_v56 = vor.u32 %v4537_v60, %v4039_v33  ;;  %v4535_v17 = vld [vmem:[#allocation11 + $0x34] sm:$0xf] }
 0x125   :  { %2573 = vmatpush.bf16.msra.mxu2 %v4174_v25  ;;  %v4976_v40 = vadd.f32 %v1918_v53, %v1905_v39  ;;  %v4555_v53 = vld [vmem:[#allocation11 + $0xd4] sm:$0xf]  ;;  %v4031_v39 = vld [vmem:[#allocation11 + $0x38] sm:$0xf0]  ;;  %v4529_v34 = vld [vmem:[#allocation11 + $0x4] sm:$0xf] }
 0x126   :  { %v2147_v32 = vmax.f32 %v4974_v57, 0.0  ;;  %v4175_v10 = vld [vmem:[#allocation11 + $0x158] sm:$0xf0]  ;;  %v4551_v2 = vld [vmem:[#allocation11 + $0xb4] sm:$0xf]  ;;  %v4034_v5 = vor.u32 %v4535_v17, %v4031_v39  ;;  %v373_v48 = vperm.slane %v4944_v36, 2 }
 0x127   :  { %2546 = vmatpush.bf16.msra.mxu0 %v4038_v15  ;;  %v1906_v43 = vpop.f32.mrf.mxu2  ;;  %v4559_v15 = vld [vmem:[#allocation11 + $0xf4] sm:$0xf]  ;;  %v2148_v29 = vmax.f32 %v4976_v40, 0.0  ;;  %v4545_v28 = vld [vmem:[#allocation11 + $0x84] sm:$0xf] }
 0x128   :  { %2560 = vmatpush.bf16.msra.mxu1 %v4102_v22  ;;  %v1907_v47 = vadd.f32 %v1906_v43, %v1893_v4  ;;  %v1920_v13 = vpop.f32.mrf.mxu3  ;;  %v4564_v22 = vld [vmem:[#allocation11 + $0x114] sm:$0xf0]  ;;  %v4130_v18 = vor.u32 %v4559_v15, %v4127_v16  ;;  %v4095_v4 = vld [vmem:[#allocation11 + $0xb8] sm:$0xf0]  ;;  %v4569_v43 = vld [vmem:[#allocation11 + $0x144] sm:$0xf]  ;;  %v4090_v16 = vor.u32 %v4549_v11, %v4087_v12 }
 0x129   :  { %2574 = vmatpush.bf16.msra.mxu2 %v4166_v42  ;;  %v4142_v25 = vor.u32 %v4564_v22, %v4141_v21  ;;  %v4047_v42 = vld [vmem:[#allocation11 + $0x58] sm:$0xf0]  ;;  %v4098_v6 = vor.u32 %v4551_v2, %v4095_v4  ;;  %v4531_v15 = vld [vmem:[#allocation11 + $0x14] sm:$0xf]  ;;  %v4135_v60 = vld [vmem:[#allocation11 + $0x108] sm:$0xf0] }
 0x12a   :  { %v4979_v62 = vadd.f32 %v1920_v13, %v1907_v47  ;;  %v4050_v9 = vor.u32 %v4539_v38, %v4047_v42  ;;  %v4170_v47 = vor.u32 %v4569_v43, %v4167_v7  ;;  %v4567_v21 = vld [vmem:[#allocation11 + $0x134] sm:$0xf]  ;;  %v4159_v22 = vld [vmem:[#allocation11 + $0x138] sm:$0xf0]  ;;  %v4007_v38 = vld [vmem:[#allocation11 + $0x8] sm:$0xf0] }
 0x12b   :  { %2547 = vmatpush.bf16.msra.mxu0 %v4030_v31  ;;  %v4151_v42 = vld [vmem:[#allocation11 + $0x128] sm:$0xf0]  ;;  %v4592_v17 = vld [vmem:[#allocation11 + $0x1f4] sm:$0xf0]  ;;  %v4245_v61 = vld [vmem:[#allocation11 + $0x1e0] sm:$0xf] }
 0x12c   :  { %2561 = vmatpush.bf16.msra.mxu1 %v4094_v41  ;;  %v2152_v31 = vmax.f32 %v4979_v62, 0.0  ;;  %v4988_v41 = vpack.c.bf16 %v2151_v19, %v2147_v32  ;;  %v4588_v2 = vld [vmem:[#allocation11 + $0x1d4] sm:$0xf0] }
 0x12d   :  { %2575 = vmatpush.bf16.msra.mxu2 %v4158_v58  ;;  %v4553_v58 = vld [vmem:[#allocation11 + $0xc4] sm:$0xf]  ;;  %v4584_v43 = vld [vmem:[#allocation11 + $0x1b4] sm:$0xf0] }
 0x12e   :  { %v4994_v3 = vpack.c.bf16 %v2152_v31, %v2148_v29  ;;  %v4106_v63 = vor.u32 %v4553_v58, %v4103_v8 }
 0x12f   :  { %2548 = vmatpush.bf16.msra.mxu0 %v4022_v55  ;;  %v4194_v55 = vor.u32 %v4575_v46, %v4191_v51  ;;  %v4010_v46 = vor.u32 %v4529_v34, %v4007_v38 }
 0x130   :  { %2562 = vmatpush.bf16.msra.mxu1 %v4086_v49  ;;  %v4114_v49 = vor.u32 %v4555_v53, %v4111_v54  ;;  %v4563_v53 = vld [vmem:[#allocation11 + $0x114] sm:$0xf]  ;;  %v4143_v54 = vld [vmem:[#allocation11 + $0x118] sm:$0xf0] }
 0x131   :  { %2576 = vmatpush.bf16.msra.mxu2 %v4150_v44  ;;  %v4023_v44 = vld [vmem:[#allocation11 + $0x28] sm:$0xf0] }
 0x132   :  { %v4026_v13 = vor.u32 %v4533_v14, %v4023_v44  ;;  %v4586_v14 = vld [vmem:[#allocation11 + $0x1c4] sm:$0xf0]  ;;  %v4221_v44 = vld [vmem:[#allocation11 + $0x1b0] sm:$0xf] }
 0x133   :  { %2549 = vmatpush.bf16.msra.mxu0 %v4014_v37  ;;  %v4571_v37 = vld [vmem:[#allocation11 + $0x154] sm:$0xf] }
 0x134   :  { %2563 = vmatpush.bf16.msra.mxu1 %v4078_v30  ;;  %v4178_v30 = vor.u32 %v4571_v37, %v4175_v10  ;;  %v4237_v10 = vld [vmem:[#allocation11 + $0x1d0] sm:$0xf] }
 0x135   :  { %2577 = vmatpush.bf16.msra.mxu2 %v4142_v25  ;;  %v4079_v25 = vld [vmem:[#allocation11 + $0x98] sm:$0xf0]  ;;  %v4238_v57 = vor.u32 %v4588_v2, %v4237_v10 }
 0x136   :  { %v4207_v10 = vld [vmem:[#allocation11 + $0x198] sm:$0xf0] }
 0x137   :  { %2550 = vmatpush.bf16.msra.mxu0 %v4006_v20  ;;  %v4015_v20 = vld [vmem:[#allocation11 + $0x18] sm:$0xf0] }
 0x138   :  { %2564 = vmatpush.bf16.msra.mxu1 %v4070_v23  ;;  %v1932_v23 = vpop.f32.mrf.mxu0  ;;  %v1946_v26 = vpop.f32.mrf.mxu1  ;;  %v4018_v27 = vor.u32 %v4531_v15, %v4015_v20  ;;  %v4222_v15 = vor.u32 %v4584_v43, %v4221_v44  ;;  %v4582_v20 = vld [vmem:[#allocation11 + $0x1a4] sm:$0xf0] }
 0x139   :  { %2578 = vmatpush.bf16.msra.mxu2 %v4134_v0 }
 0x13a   :  { %2551 = vmatmul.bf16.vlgmr.msra.gmra.mxu0 %v4988_v41 }
 0x13b   :  { %2599 = vmatpush.bf16.msrb.mxu0 %v4066_v24  ;;  %2565 = vmatmul.bf16.vlgmr.msra.gmra.mxu1 %v4994_v3  ;;  %v4547_v24 = vld [vmem:[#allocation11 + $0x94] sm:$0xf] }
 0x13c   :  { %2613 = vmatpush.bf16.msrb.mxu1 %v4130_v18  ;;  %v4162_v18 = vor.u32 %v4567_v21, %v4159_v22  ;;  %v4082_v35 = vor.u32 %v4547_v24, %v4079_v25  ;;  %v4205_v25 = vld [vmem:[#allocation11 + $0x190] sm:$0xf] }
 0x13d   :  { %2627 = vmatpush.bf16.msrb.mxu2 %v4194_v55  ;;  %v1933_v55 = vadd.f32 %v1932_v23, %v373_v48 }
 0x13f   :  { %2600 = vmatpush.bf16.msrb.mxu0 %v4058_v45  ;;  %v4565_v45 = vld [vmem:[#allocation11 + $0x124] sm:$0xf]  ;;  %v1960_v52 = vpop.f32.mrf.mxu2  ;;  %v1947_v8 = vadd.f32 %v1946_v26, %v1933_v55 }
 0x140   :  { %2614 = vmatpush.bf16.msrb.mxu1 %v4122_v50  ;;  %v4071_v50 = vld [vmem:[#allocation11 + $0x88] sm:$0xf0]  ;;  %v4154_v0 = vor.u32 %v4565_v45, %v4151_v42  ;;  %v1974_v1 = vpop.f32.mrf.mxu3  ;;  %v1948_v33 = vpop.f32.mrf.mxu1  ;;  %v4197_v42 = vld [vmem:[#allocation11 + $0x180] sm:$0xf]  ;;  %v4589_v55 = vld [vmem:[#allocation11 + $0x1e4] sm:$0xf] }
 0x141   :  { %2628 = vmatpush.bf16.msrb.mxu2 %v4186_v59  ;;  %v4074_v51 = vor.u32 %v4545_v28, %v4071_v50  ;;  %v1934_v59 = vpop.f32.mrf.mxu0  ;;  %v1961_v37 = vadd.f32 %v1960_v52, %v1947_v8  ;;  %v4591_v50 = vld [vmem:[#allocation11 + $0x1f4] sm:$0xf] }
 0x142   :  { %v1935_v39 = vadd.f32 %v1934_v59, %v373_v48  ;;  %v4578_v48 = vld [vmem:[#allocation11 + $0x184] sm:$0xf0]  ;;  %v4587_v59 = vld [vmem:[#allocation11 + $0x1d4] sm:$0xf] }
 0x143   :  { %2601 = vmatpush.bf16.msrb.mxu0 %v4050_v9  ;;  %v4146_v9 = vor.u32 %v4563_v53, %v4143_v54  ;;  %v4198_v52 = vor.u32 %v4578_v48, %v4197_v42 }
 0x144   :  { %2615 = vmatpush.bf16.msrb.mxu1 %v4114_v49  ;;  %v4561_v49 = vld [vmem:[#allocation11 + $0x104] sm:$0xf] }
 0x145   :  { %2629 = vmatpush.bf16.msrb.mxu2 %v4178_v30  ;;  %v4138_v58 = vor.u32 %v4561_v49, %v4135_v60  ;;  %v1975_v30 = vadd.f32 %v1974_v1, %v1961_v37  ;;  %v4247_v1 = vld [vmem:[#allocation11 + $0x1e8] sm:$0xf0]  ;;  %v4239_v49 = vld [vmem:[#allocation11 + $0x1d8] sm:$0xf0] }
 0x146   :  { %v4242_v60 = vor.u32 %v4587_v59, %v4239_v49 }
 0x147   :  { %2602 = vmatpush.bf16.msrb.mxu0 %v4042_v56  ;;  %v4253_v56 = vld [vmem:[#allocation11 + $0x1f0] sm:$0xf] }
 0x148   :  { %2616 = vmatpush.bf16.msrb.mxu1 %v4106_v63  ;;  %v4254_v63 = vor.u32 %v4592_v17, %v4253_v56  ;;  %v1976_v4 = vpop.f32.mrf.mxu3  ;;  %v4583_v56 = vld [vmem:[#allocation11 + $0x1b4] sm:$0xf]  ;;  %v4223_v17 = vld [vmem:[#allocation11 + $0x1b8] sm:$0xf0] }
 0x149   :  { %2630 = vmatpush.bf16.msrb.mxu2 %v4170_v47 }
 0x14a   :  { %2585 = vmatpush.bf16.msra.mxu3 %v4254_v63  ;;  %v4226_v63 = vor.u32 %v4583_v56, %v4223_v17 }
 0x14b   :  { %2603 = vmatpush.bf16.msrb.mxu0 %v4034_v5  ;;  %v4229_v5 = vld [vmem:[#allocation11 + $0x1c0] sm:$0xf] }
 0x14c   :  { %2617 = vmatpush.bf16.msrb.mxu1 %v4098_v6  ;;  %v4230_v6 = vor.u32 %v4586_v14, %v4229_v5 }
 0x14d   :  { %2631 = vmatpush.bf16.msrb.mxu2 %v4162_v18  ;;  %v4580_v18 = vld [vmem:[#allocation11 + $0x194] sm:$0xf0] }
 0x14e   :  { %v4206_v45 = vor.u32 %v4580_v18, %v4205_v25 }
 0x14f   :  { %2604 = vmatpush.bf16.msrb.mxu0 %v4026_v13 }
 0x150   :  { %2618 = vmatpush.bf16.msrb.mxu1 %v4090_v16  ;;  %v4213_v16 = vld [vmem:[#allocation11 + $0x1a0] sm:$0xf] }
 0x151   :  { %2632 = vmatpush.bf16.msrb.mxu2 %v4154_v0  ;;  %v4214_v24 = vor.u32 %v4582_v20, %v4213_v16  ;;  %v4255_v0 = vld [vmem:[#allocation11 + $0x1f8] sm:$0xf0] }
 0x152   :  { %v4258_v53 = vor.u32 %v4591_v50, %v4255_v0 }
 0x153   :  { %2605 = vmatpush.bf16.msrb.mxu0 %v4018_v27 }
 0x154   :  { %2619 = vmatpush.bf16.msrb.mxu1 %v4082_v35 }
 0x155   :  { %2633 = vmatpush.bf16.msrb.mxu2 %v4146_v9  ;;  %v4250_v9 = vor.u32 %v4589_v55, %v4247_v1 }
 0x157   :  { %2606 = vmatpush.bf16.msrb.mxu0 %v4010_v46 }
 0x158   :  { %2620 = vmatpush.bf16.msrb.mxu1 %v4074_v51 }
 0x159   :  { %2634 = vmatpush.bf16.msrb.mxu2 %v4138_v58  ;;  %v4231_v58 = vld [vmem:[#allocation11 + $0x1c8] sm:$0xf0] }
 0x15a   :  { %2607 = vmatmul.bf16.vlgmr.msrb.gmra.mxu0 %v4988_v41  ;;  %v1949_v41 = vadd.f32 %v1948_v33, %v1935_v39  ;;  %v4585_v33 = vld [vmem:[#allocation11 + $0x1c4] sm:$0xf] }
 0x15b   :  { %2793 = vmatpush.msra.mxu0 %v2151_v19  ;;  %2621 = vmatmul.bf16.vlgmr.msrb.gmra.mxu1 %v4994_v3  ;;  %v4590_v19 = vld [vmem:[#allocation11 + $0x1e4] sm:$0xf0]  ;;  %v1988_v3 = vpop.f32.mrf.mxu0  ;;  %v4234_v8 = vor.u32 %v4585_v33, %v4231_v58 }
 0x15c   :  { %2813 = vmatpush.msra.mxu1 %v2152_v31  ;;  %v4246_v62 = vor.u32 %v4590_v19, %v4245_v61  ;;  %v1962_v31 = vpop.f32.mrf.mxu2  ;;  %v4581_v61 = vld [vmem:[#allocation11 + $0x1a4] sm:$0xf]  ;;  %v4215_v19 = vld [vmem:[#allocation11 + $0x1a8] sm:$0xf0] }
 0x15d   :  { %2794 = vmatpush.msra.mxu0 %v2147_v32  ;;  %v2002_v32 = vpop.f32.mrf.mxu1  ;;  %v1963_v40 = vadd.f32 %v1962_v31, %v1949_v41  ;;  %v4218_v37 = vor.u32 %v4581_v61, %v4215_v19  ;;  %v4579_v31 = vld [vmem:[#allocation11 + $0x194] sm:$0xf]  ;;  %v374_v41 = vperm.slane %v4944_v36, 3 }
 0x15e   :  { %2814 = vmatpush.msra.mxu1 %v2148_v29  ;;  %2586 = vmatpush.bf16.msra.mxu3 %v4246_v62  ;;  %v1989_v29 = vadd.f32 %v1988_v3, %v1975_v30  ;;  %v4210_v2 = vor.u32 %v4579_v31, %v4207_v10  ;;  %v4577_v3 = vld [vmem:[#allocation11 + $0x184] sm:$0xf] }
 0x15f   :  { %v1977_v7 = vadd.f32 %v1976_v4, %v1963_v40 }
 0x160   :  { %v2003_v12 = vadd.f32 %v2002_v32, %v1989_v29  ;;  %v2030_v13 = vpop.f32.mrf.mxu3 }
 0x162   :  { %2587 = vmatpush.bf16.msra.mxu3 %v4238_v57  ;;  %v4199_v57 = vld [vmem:[#allocation11 + $0x188] sm:$0xf0] }
 0x163   :  { %v1990_v47 = vpop.f32.mrf.mxu0  ;;  %v4202_v32 = vor.u32 %v4577_v3, %v4199_v57 }
 0x164   :  { %v2016_v11 = vpop.f32.mrf.mxu2  ;;  %v1991_v21 = vadd.f32 %v1990_v47, %v1977_v7 }
 0x165   :  { %v2004_v22 = vpop.f32.mrf.mxu1  ;;  %v2017_v23 = vadd.f32 %v2016_v11, %v2003_v12 }
 0x166   :  { %2588 = vmatpush.bf16.msra.mxu3 %v4230_v6  ;;  %v2005_v26 = vadd.f32 %v2004_v22, %v1991_v21 }
 0x167   :  { %v2031_v34 = vadd.f32 %v2030_v13, %v2017_v23 }
 0x168   :  { %v2032_v38 = vpop.f32.mrf.mxu3 }
 0x169   :  { %v2149_v46 = vmax.f32 %v2031_v34, 0.0 }
 0x16a   :  { %2589 = vmatpush.bf16.msra.mxu3 %v4222_v15 }
 0x16c   :  { %v2018_v27 = vpop.f32.mrf.mxu2 }
 0x16d   :  { %v2019_v35 = vadd.f32 %v2018_v27, %v2005_v26 }
 0x16e   :  { %2590 = vmatpush.bf16.msra.mxu3 %v4214_v24 }
 0x16f   :  { %v2033_v28 = vadd.f32 %v2032_v38, %v2019_v35 }
 0x171   :  { %v2153_v51 = vmax.f32 %v2033_v28, 0.0 }
 0x172   :  { %2591 = vmatpush.bf16.msra.mxu3 %v4206_v45 }
 0x173   :  { %v2157_v54 = vpack.c.bf16 %v2153_v51, %v2149_v46 }
 0x175   :  { %2579 = vmatmul.bf16.vlgmr.msra.gmra.mxu2 %v2157_v54 }
 0x176   :  { %2592 = vmatpush.bf16.msra.mxu3 %v4198_v52  ;;  %2833 = vmatpush.msra.mxu2 %v2153_v51 }
 0x177   :  { %v2044_v39 = vpop.f32.mrf.mxu0 }
 0x178   :  { %2834 = vmatpush.msra.mxu2 %v2149_v46  ;;  %v2058_v62 = vpop.f32.mrf.mxu1  ;;  %v2045_v5 = vadd.f32 %v2044_v39, %v374_v41 }
 0x17a   :  { %2641 = vmatpush.bf16.msrb.mxu3 %v4258_v53  ;;  %v2059_v29 = vadd.f32 %v2058_v62, %v2045_v5 }
 0x17e   :  { %2642 = vmatpush.bf16.msrb.mxu3 %v4250_v9 }
 0x17f   :  { %v2072_v4 = vpop.f32.mrf.mxu2  ;;  %v2046_v14 = vpop.f32.mrf.mxu0 }
 0x180   :  { %v2086_v30 = vpop.f32.mrf.mxu3  ;;  %v2060_v40 = vpop.f32.mrf.mxu1  ;;  %v2047_v6 = vadd.f32 %v2046_v14, %v374_v41  ;;  %v2073_v43 = vadd.f32 %v2072_v4, %v2059_v29 }
 0x182   :  { %2643 = vmatpush.bf16.msrb.mxu3 %v4242_v60  ;;  %v2061_v7 = vadd.f32 %v2060_v40, %v2047_v6  ;;  %v2087_v13 = vadd.f32 %v2086_v30, %v2073_v43 }
 0x185   :  { %2635 = vmatmul.bf16.vlgmr.msrb.gmra.mxu2 %v2157_v54 }
 0x186   :  { %2644 = vmatpush.bf16.msrb.mxu3 %v4234_v8 }
 0x187   :  { %v2074_v44 = vpop.f32.mrf.mxu2 }
 0x188   :  { %v2088_v11 = vpop.f32.mrf.mxu3  ;;  %v2075_v36 = vadd.f32 %v2074_v44, %v2061_v7 }
 0x18a   :  { %2645 = vmatpush.bf16.msrb.mxu3 %v4226_v63  ;;  %v2089_v20 = vadd.f32 %v2088_v11, %v2075_v36 }
 0x18e   :  { %2646 = vmatpush.bf16.msrb.mxu3 %v4218_v37 }
 0x192   :  { %2647 = vmatpush.bf16.msrb.mxu3 %v4210_v2 }
 0x196   :  { %2648 = vmatpush.bf16.msrb.mxu3 %v4202_v32 }
 0x197   :  { %v2100_v12 = vpop.f32.mrf.mxu0 }
 0x198   :  { %v2114_v47 = vpop.f32.mrf.mxu1  ;;  %v2101_v15 = vadd.f32 %v2100_v12, %v2087_v13 }
 0x19a   :  { %v2115_v23 = vadd.f32 %v2114_v47, %v2101_v15  ;;  %v4611_v47 = vld [vmem:[%s5042_s4] ss:$0 sm:$0xff] }
 0x19f   :  { %v2128_v16 = vpop.f32.mrf.mxu2  ;;  %v2102_v22 = vpop.f32.mrf.mxu0 }
 0x1a0   :  { %v2142_v21 = vpop.f32.mrf.mxu3  ;;  %v2103_v24 = vadd.f32 %v2102_v22, %v2089_v20  ;;  %v2129_v25 = vadd.f32 %v2128_v16, %v2115_v23  ;;  %v2116_v18 = vpop.f32.mrf.mxu1 }
 0x1a2   :  { %v2117_v26 = vadd.f32 %v2116_v18, %v2103_v24  ;;  %v2143_v34 = vadd.f32 %v2142_v21, %v2129_v25 }
 0x1a4   :  { %v2150_v42 = vmax.f32 %v2143_v34, 0.0 }
 0x1a7   :  { %v2130_v27 = vpop.f32.mrf.mxu2 }
 0x1a8   :  { %v2131_v35 = vadd.f32 %v2130_v27, %v2117_v26  ;;  %v2144_v38 = vpop.f32.mrf.mxu3 }
 0x1aa   :  { %v2145_v45 = vadd.f32 %v2144_v38, %v2131_v35 }
 0x1ac   :  { %v2154_v48 = vmax.f32 %v2145_v45, 0.0 }
 0x1ae   :  { %v2158_v28 = vpack.c.bf16 %v2154_v48, %v2150_v42 }
 0x1b0   :  { %2593 = vmatmul.bf16.vlgmr.msra.gmra.mxu3 %v2158_v28 }
 0x1b1   :  { %2853 = vmatpush.msra.mxu3 %v2154_v48  ;;  %v4815_v48 = vmov 0.0  }
 0x1b2   :  { %99 = vst.msk [vmem:[#allocation3] sm:$0x1] %vm97_vm8, %v4815_v48 }
 0x1b3   :  { %2854 = vmatpush.msra.mxu3 %v2150_v42  ;;  %v4814_v42 = vmov -1e+30  }
 0x1b4   :  { %98 = vst.msk [vmem:[#allocation2] sm:$0x1] %vm97_vm8, %v4814_v42 }
 0x1b7   :  { %v2552_v50 = vpop.f32.mrf.mxu0 }
 0x1b8   :  { %v2566_v0 = vpop.f32.mrf.mxu1 }
 0x1b9   :  { %v2567_v30 = vadd.f32 %v2566_v0, %v2552_v50  ;;  %v4816_v50 = vmov 0  }
 0x1ba   :  { %4609 = vset.pattern.permute.xlu2 %v4816_v50  ;;  %4610 = vset.pattern.permute.xlu0 %v4816_v50 }
 0x1bf   :  { %v2554_v51 = vpop.f32.mrf.mxu0 }
 0x1c0   :  { %2649 = vmatmul.bf16.vlgmr.msrb.gmra.mxu3 %v2158_v28  ;;  %v2568_v52 = vpop.f32.mrf.mxu1 }
 0x1c1   :  { %v2569_v43 = vadd.f32 %v2568_v52, %v2554_v51 }
 0x1d7   :  { %v2608_v55 = vpop.f32.mrf.mxu0 }
 0x1d8   :  { %v2622_v1 = vpop.f32.mrf.mxu1 }
 0x1d9   :  { %v2623_v49 = vadd.f32 %v2622_v1, %v2608_v55  ;;  %v2707_v1 = vld [vmem:[#allocation2] sm:$0x1] }
 0x1df   :  { %v2610_v8 = vpop.f32.mrf.mxu0 }
 0x1e0   :  { %v2624_v56 = vpop.f32.mrf.mxu1 }
 0x1e1   :  { %v2625_v39 = vadd.f32 %v2624_v56, %v2610_v8 }
 0x1f8   :  { %v2580_v46 = vpop.f32.mrf.mxu2 }
 0x1f9   :  { %v2581_v57 = vadd.f32 %v2580_v46, %v2567_v30 }
 0x200   :  { %v2582_v53 = vpop.f32.mrf.mxu2 }
 0x201   :  { %v2583_v36 = vadd.f32 %v2582_v53, %v2569_v43 }
 0x208   :  { %v2636_v59 = vpop.f32.mrf.mxu2 }
 0x209   :  { %v2637_v60 = vadd.f32 %v2636_v59, %v2623_v49  ;;  %v100_v49 = vlaneseq }
 0x20b   :  { %vm5016_vm9 = vcmp.lt.s32.totalorder %v100_v49, 512 }
 0x20c   :  { %104 = vst.msk [vmem:[#allocation4] sm:$0xf] %vm5016_vm9, %v4815_v48 }
 0x210   :  { %v2638_v63 = vpop.f32.mrf.mxu2 }
 0x211   :  { %v2639_v61 = vadd.f32 %v2638_v63, %v2625_v39 }
 0x233   :  { %v2594_v54 = vpop.f32.mrf.mxu3 }
 0x234   :  { %v2595_v14 = vadd.f32 %v2594_v54, %v2581_v57  ;;  %v2728_v57 = vld [vmem:[#allocation3] sm:$0x1] }
 0x236   :  { %v2655_v11 = vmax.f32 %v2595_v14, 0.0 }
 0x23b   :  { %v2596_v9 = vpop.f32.mrf.mxu3 }
 0x23c   :  { %v2597_v21 = vadd.f32 %v2596_v9, %v2583_v36 }
 0x23e   :  { %v2656_v27 = vmax.f32 %v2597_v21, 0.0 }
 0x243   :  { %v2650_v33 = vpop.f32.mrf.mxu3 }
 0x244   :  { %v2651_v58 = vadd.f32 %v2650_v33, %v2637_v60 }
 0x246   :  { %v4259_v17 = vmul.f32 -1.442695, %v2651_v58 }
 0x248   :  { %4612 = vpow2.f32 %v4259_v17 }
 0x24b   :  { %v2652_v19 = vpop.f32.mrf.mxu3 }
 0x24c   :  { %v2653_v37 = vadd.f32 %v2652_v19, %v2639_v61 }
 0x24e   :  { %v4613_v62 = vpop.eup %4612  ;;  %v4260_v31 = vmul.f32 -1.442695, %v2653_v37 }
 0x24f   :  { %v2663_v10 = vadd.f32 1.0, %v4613_v62 }
 0x250   :  { %4614 = vpow2.f32 %v4260_v31 }
 0x251   :  { %4616 = vrcp.f32 %v2663_v10  ;;  %v2676_v5 = vand.u32 2147483648, %v2663_v10  ;;  %v2674_v29 = vand.u32 2147483647, %v2663_v10  ;;  %vm2670_vm1 = vweird.f32 %v2663_v10 }
 0x253   :  { %v2677_v7 = vor.u32 1.1754944e-38, %v2676_v5  ;;  %vm2675_vm3 = vcmp.eq.f32.partialorder %v2674_v29, 8.507059e+37 }
 0x256   :  { %v4615_v2 = vpop.eup %4614 }
 0x257   :  { %v4617_v41 = vpop.eup %4616  ;;  %v2664_v4 = vadd.f32 1.0, %v4615_v2 }
 0x258   :  { %v2666_v3 = vmul.f32 %v4617_v41, %v2663_v10  ;;  %vm2671_vm0 = vweird.f32 %v4617_v41 }
 0x259   :  { %4618 = vrcp.f32 %v2664_v4  ;;  %vm2672_vm2 = vmor %vm2670_vm1, %vm2671_vm0  ;;  %v2691_v22 = vand.u32 2147483648, %v2664_v4  ;;  %v2689_v25 = vand.u32 2147483647, %v2664_v4  ;;  %vm2685_vm5 = vweird.f32 %v2664_v4 }
 0x25a   :  { %v2667_v32 = vsub.f32 1.0, %v2666_v3 }
 0x25b   :  { %v2692_v26 = vor.u32 1.1754944e-38, %v2691_v22  ;;  %vm2690_vm7 = vcmp.eq.f32.partialorder %v2689_v25, 8.507059e+37 }
 0x25c   :  { %v2668_v40 = vmul.f32 %v4617_v41, %v2667_v32 }
 0x25e   :  { %v2669_v6 = vadd.f32 %v4617_v41, %v2668_v40 }
 0x25f   :  { %v4619_v44 = vpop.eup %4618 }
 0x260   :  { %v2673_v12 = vsel %vm2672_vm2, %v4617_v41, %v2669_v6  ;;  %v2681_v13 = vmul.f32 %v4619_v44, %v2664_v4  ;;  %vm2686_vm4 = vweird.f32 %v4619_v44 }
 0x261   :  { %v2678_v15 = vsel %vm2675_vm3, %v2677_v7, %v2673_v12  ;;  %vm2687_vm6 = vmor %vm2685_vm5, %vm2686_vm4  ;;  %v2859_v12 = vld [vmem:[#allocation4] sm:$0xf] }
 0x262   :  { %v2695_v16 = vmul.f32 %v2678_v15, %v2655_v11  ;;  %v2682_v20 = vsub.f32 1.0, %v2681_v13 }
 0x264   :  { %v2701_v23 = vmul.f32 %v4611_v47, %v2695_v16  ;;  %v2683_v24 = vmul.f32 %v4619_v44, %v2682_v20 }
 0x266   :  { %2703 = vadd.xlane.f32.xlu0 %v2701_v23  ;;  %v2684_v18 = vadd.f32 %v4619_v44, %v2683_v24 }
 0x268   :  { %v2688_v34 = vsel %vm2687_vm6, %v4619_v44, %v2684_v18 }
 0x269   :  { %v2693_v35 = vsel %vm2690_vm7, %v2692_v26, %v2688_v34 }
 0x26a   :  { %v2696_v38 = vmul.f32 %v2693_v35, %v2656_v27 }
 0x26c   :  { %v2702_v45 = vmul.f32 %v4611_v47, %v2696_v38 }
 0x26e   :  { %2705 = vadd.xlane.f32.xlu0 %v2702_v45 }
 0x2d9   :  { %v2704_v28 = vpop.xlane.xlu0 %2703 }
 0x2e1   :  { %v2706_v0 = vpop.xlane.xlu0 %2705 }
 0x2e2   :  { %v2708_v46 = vmax.f32 %v2704_v28, %v2706_v0 }
 0x2e4   :  { %v2709_v51 = vrot.slane %v2708_v46, 4 }
 0x2e6   :  { %v2710_v52 = vmax.f32 %v2708_v46, %v2709_v51 }
 0x2e8   :  { %v2711_v53 = vrot.slane %v2710_v52, 2 }
 0x2ea   :  { %v2712_v54 = vmax.f32 %v2710_v52, %v2711_v53 }
 0x2ec   :  { %v2713_v55 = vrot.slane %v2712_v54, 1 }
 0x2ee   :  { %v2714_v9 = vmax.f32 %v2712_v54, %v2713_v55 }
 0x2f0   :  { %v2715_v59 = vmax.f32 %v2707_v1, %v2714_v9 }
 0x2f2   :  { %v2720_v60 = vperm.slane %v2715_v59, 0  ;;  %2887 = vst.msk [vmem:[#allocation2] sm:$0x1] %vm97_vm8, %v2715_v59  ;;  %v2716_v33 = vsub.f32 %v2707_v1, %v2715_v59 }
 0x2f4   :  { %v2722_v8 = vsub.f32 %v2704_v28, %v2720_v60  ;;  %v2723_v56 = vsub.f32 %v2706_v0, %v2720_v60  ;;  %v2717_v17 = vmul.f32 1.442695, %v2716_v33 }
 0x2f6   :  { %v2724_v63 = vmul.f32 1.442695, %v2722_v8  ;;  %v2726_v39 = vmul.f32 1.442695, %v2723_v56  ;;  %4620 = vpow2.f32 %v2717_v17 }
 0x2f8   :  { %4622 = vpow2.f32 %v2724_v63 }
 0x2f9   :  { %4624 = vpow2.f32 %v2726_v39  ;;  %v2891_v61 = vld [vmem:[#allocation2] sm:$0x1] }
 0x2fa   :  { %2892 = vst.msk [vmem:[#allocation13] sm:$0x1] %vm97_vm8, %v2891_v61 }
 0x2fb   :  { %2907 = dma.vmem_to_hbm [thread:$0]  %s2903_s30, 16, %s2905_s10, [#allocation7]  }
 0x2fc   :  { %v4621_v19 = vpop.eup %4620 }
 0x2fd   :  { %2862 = vperm.xlu2 %4609, %v4621_v19   ;;  %v2729_v14 = vmul.f32 %v4621_v19, %v2728_v57 }
 0x2fe   :  { %v4623_v37 = vpop.eup %4622 }
 0x2ff   :  { %v4625_v62 = vpop.eup %4624  ;;  %v2731_v31 = vsel %vm2730_vm10, %v4623_v37, 0.0  ;;  %2743 = vxpose.xlu1.b32.start [1/2] (short) (narrow) %v4623_v37, 8 }
 0x300   :  { %v2732_v10 = vsel %vm2730_vm10, %v4625_v62, 0.0 }
 0x301   :  { %v2733_v2 = vadd.f32 %v2732_v10, %v2731_v31 }
 0x303   :  { %v2734_v41 = vrot.slane %v2733_v2, 4 }
 0x305   :  { %v2735_v4 = vadd.f32 %v2734_v41, %v2733_v2 }
 0x307   :  { %v2736_v30 = vrot.slane %v2735_v4, 2  ;;  %2744 = vxpose.xlu1.b32.end [2/2] (short) (narrow) %v4625_v62, 8 }
 0x309   :  { %v2737_v3 = vadd.f32 %v2736_v30, %v2735_v4 }
 0x30b   :  { %v2738_v32 = vrot.slane %v2737_v3, 1 }
 0x30d   :  { %v2739_v5 = vadd.f32 %v2738_v32, %v2737_v3 }
 0x30f   :  { %v2740_v40 = vadd.f32 %v2739_v5, %v2729_v14 }
 0x311   :  { %2742 = vst.msk [vmem:[#allocation3] sm:$0x1] %vm97_vm8, %v2740_v40 }
 0x318   :  { %v2893_v29 = vld [vmem:[#allocation3] sm:$0x1] }
 0x319   :  { %2894 = vst.msk [vmem:[#allocation14] sm:$0x1] %vm97_vm8, %v2893_v29 }
 0x31a   :  { %2918 = dma.vmem_to_hbm [thread:$0]  %s2914_s28, 16, %s2916_s26, [#allocation15]  }
 0x357   :  { %v2863_v44 = vpop.permute.xlu2 %2862 }
 0x358   :  { %v2865_v7 = vperm.slane %v2863_v44, 0 }
 0x35a   :  { %v2866_v20 = vmul.f32 %v2865_v7, %v2859_v12 }
 0x3a3   :  { %v2759_v6 = vpop.trf.xlu1 }
 0x3a4   :  { %4261 = vmatmul.msk.f32.vlgmr.msra.gmra.mxu0 %vm2775_vm11, %v2759_v6  ;;  %4262 = vmatmul.msk.f32.vlgmr.msra.gmra.mxu1 %vm2775_vm11, %v2759_v6 }
 0x3a5   :  { %4263 = vmatmul.msk.f32.vlgmr.msra.gmra.mxu2 %vm2775_vm11, %v2759_v6  ;;  %4264 = vmatmul.msk.f32.vlgmr.msra.gmra.mxu3 %vm2775_vm11, %v2759_v6 }
 0x421   :  { %v2816_v43 = vpop.f32.mrf.mxu1  ;;  %v2796_v16 = vpop.f32.mrf.mxu0 }
 0x422   :  { %v2871_v11 = vrot.slane %v2816_v43, 7 }
 0x424   :  { %v2875_v21 = vsel %vm2874_vm12, %v2796_v16, %v2871_v11 }
 0x428   :  { %v2836_v47 = vpop.f32.mrf.mxu2  ;;  %v2856_v13 = vpop.f32.mrf.mxu3 }
 0x429   :  { %v2872_v36 = vrot.slane %v2836_v47, 6  ;;  %v2873_v15 = vrot.slane %v2856_v13, 5 }
 0x42b   :  { %v2877_v22 = vsel %vm2876_vm13, %v2872_v36, %v2873_v15 }
 0x42c   :  { %v2879_v23 = vsel %vm2878_vm14, %v2875_v21, %v2877_v22 }
 0x42d   :  { %v2881_v24 = vadd.f32 %v2879_v23, %v2866_v20 }
 0x42f   :  { %2886 = vst.msk [vmem:[#allocation4] sm:$0xf] %vm5016_vm9, %v2881_v24 }
 0x436   :  { %v2895_v25 = vld [vmem:[#allocation4] sm:$0xf] }
 0x437   :  { %2896 = vst.msk [vmem:[#allocation16] sm:$0xf] %vm5016_vm9, %v2895_v25 }
 0x438   :  { %2929 = dma.vmem_to_hbm [thread:$0]  %s2925_s6, 64, %s2927_s13, [#allocation15]  }
 0x439   :  { %4800 = dma.done.wait [#allocation7], 16  }
 0x43a   :  { %4801 = vsyncadd [#allocation7], 4294967280 }
 0x43b   :  { %4802 = dma.done.wait [#allocation15], 80  }
 0x43c   :  { %4803 = vsyncadd [#allocation15], 4294967216 }
 0x43d   :  { %2942 = vsyncpa [#allocation6], 1 }
 0x43e   :  { %2943 = vsyncpa [#allocation9], 1 }
 0x43f   :  { %2944 = vsyncpa [#allocation12], 1 }
 0x440   :  { %2945 = vsyncpa [#allocation7], 1 }
 0x441   :  { %2946 = vsyncpa [#allocation15], 1 }

</bundles_post_ra>
